<compile_context>
chip_gen: v7x
topology: tpu7x:2x2x1
jax: 0.10.0
libtpu: 0.0.40
codegen_flags: <defaults>
</compile_context>

<pallas_src>
import functools

import jax
import jax.numpy as jnp
import numpy as np
from jax.experimental import pallas as pl
from jax.experimental.pallas import tpu as pltpu

PAD_IDX = 0


# ---------------------------------------------------------------------------
# Pallas kernel: fused bidirectional LSTM recurrence + prediction head
# ---------------------------------------------------------------------------
def _bilstm_kernel(emb_ref,    # (T*Bp, E)  f32, time-major, flattened
                   len_ref,    # (Bp, 1)    int32 valid lengths
                   ismax_ref,  # (Bp, 1)    f32, 1.0 where length == max length
                   wih_ref,    # (E, 8H)    f32, interleaved gate columns, both dirs
                   whh_ref,    # (2H, 8H)   f32, block-diagonal recurrent weight
                   bias_ref,   # (1, 8H)    f32, b_ih + b_hh, interleaved
                   wpred_ref,  # (2H, 1)    f32 prediction head weight
                   bpred_ref,  # (1, 1)     f32 prediction head bias
                   out_ref):   # (Bp, 1)    f32
    Bp = len_ref.shape[0]
    TB = emb_ref.shape[0]
    T = TB // Bp
    H2 = whh_ref.shape[0]          # 2H  (fwd/bwd halves of the state)
    H = H2 // 2
    G = whh_ref.shape[1]           # 8H  (4 gates x 2 directions, interleaved)

    # ---- hoisted input projection: one well-shaped matmul over all timesteps,
    #      bias folded in (broadcast done once, outside the recurrence).
    gates_in = (jnp.dot(emb_ref[...], wih_ref[...],
                        preferred_element_type=jnp.float32)
                + bias_ref[...])                               # (T*Bp, 8H)

    whh = whh_ref[...]                                         # resident (2H, 8H)
    length = len_ref[...]                                      # (Bp, 1) int32

    # lane-index helpers, computed once (hoisted; JAX does not CSE broadcasts)
    lane_g = jax.lax.broadcasted_iota(jnp.int32, (1, G), 1)    # over 8H
    fwd_g = (lane_g % H2) < H                                  # fwd gate columns
    is_tanh_gate = (lane_g >= 2 * H2) & (lane_g < 3 * H2)      # the "g" gate block
    lane_s = jax.lax.broadcasted_iota(jnp.int32, (1, H2), 1)   # over 2H
    fwd_s = lane_s < H                                         # fwd half of state

    h = jnp.zeros((Bp, H2), jnp.float32)                       # [h_f | h_b]
    c = jnp.zeros((Bp, H2), jnp.float32)                       # [c_f | c_b]

    # T is small and static: full unroll -> every slice below is static and the
    # scheduler sees the whole serial chain.
    # TODO(synk): for large T / large B, tile T with a grid ("arbitrary" axis,
    # h/c in VMEM scratch) and add a batch-parallel grid axis for v7x's 2 TCs.
    for t in range(T):
        tr = T - 1 - t
        gi_f = gates_in[t * Bp:(t + 1) * Bp, :]       # fwd inputs at time t
        gi_b = gates_in[tr * Bp:(tr + 1) * Bp, :]     # bwd inputs at time T-1-t
        gi = jnp.where(fwd_g, gi_f, gi_b)             # (Bp, 8H)

        # single fused recurrent matmul for both directions
        g = gi + jnp.dot(h, whh, preferred_element_type=jnp.float32)

        # sigmoid(x) = 0.5*(tanh(x/2)+1): one tanh covers all 4 gate blocks
        pre = jnp.where(is_tanh_gate, g, 0.5 * g)
        th = jnp.tanh(pre)
        act = jnp.where(is_tanh_gate, th, 0.5 * th + 0.5)      # (Bp, 8H)

        i_g = act[:, 0 * H2:1 * H2]
        f_g = act[:, 1 * H2:2 * H2]
        g_g = act[:, 2 * H2:3 * H2]
        o_g = act[:, 3 * H2:4 * H2]

        c_new = f_g * c + i_g * g_g
        h_new = o_g * jnp.tanh(c_new)

        # packed-sequence semantics: state only advances on valid timesteps.
        # forward half uses time t, backward half uses time T-1-t.
        te = jnp.where(fwd_s, t, tr)                  # (1, 2H) effective time
        valid = te < length                           # (Bp, 2H) bool
        h = jnp.where(valid, h_new, h)
        c = jnp.where(valid, c_new, c)

    # forward half of the model output is zero unless this row has max length
    scale = jnp.where(fwd_s, ismax_ref[...], 1.0)     # (Bp, 2H)
    out_cat = h * scale                               # [ismax*h_f | h_b]

    # fused prediction head: one (Bp, 2H) @ (2H, 1) matmul
    out_ref[...] = (jnp.dot(out_cat, wpred_ref[...],
                            preferred_element_type=jnp.float32)
                    + bpred_ref[...])


def _run_bilstm_kernel(emb_tm, lengths, ismax, wih, whh, bias, wpred, bpred):
    Bp = lengths.shape[0]
    n_in = 8
    return pl.pallas_call(
        _bilstm_kernel,
        out_shape=jax.ShapeDtypeStruct((Bp, 1), jnp.float32),
        in_specs=[pl.BlockSpec(memory_space=pltpu.MemorySpace.VMEM)] * n_in,
        out_specs=pl.BlockSpec(memory_space=pltpu.MemorySpace.VMEM),
    )(emb_tm, lengths, ismax, wih, whh, bias, wpred, bpred)


# ---------------------------------------------------------------------------
# JAX glue: weight packing, embedding lookup, batch padding, kernel call
# ---------------------------------------------------------------------------
def _interleave_gates(wf, wb, H):
    """Interleave per-gate column blocks: [i_f,i_b,f_f,f_b,g_f,g_b,o_f,o_b]."""
    parts = []
    for k in range(4):
        parts.append(wf[..., k * H:(k + 1) * H])
        parts.append(wb[..., k * H:(k + 1) * H])
    return jnp.concatenate(parts, axis=-1)


def _pack_params(params):
    H = params["whh_f"].shape[0]
    wih = _interleave_gates(params["wih_f"], params["wih_b"], H)      # (E, 8H)
    bias = _interleave_gates(params["b_f"], params["b_b"], H)         # (1, 8H)
    z = jnp.zeros_like(params["whh_f"])
    whh_f_full = jnp.concatenate([params["whh_f"], z], axis=0)        # (2H, 4H)
    whh_b_full = jnp.concatenate([z, params["whh_b"]], axis=0)        # (2H, 4H)
    whh = _interleave_gates(whh_f_full, whh_b_full, H)                # (2H, 8H)
    wpred = jnp.concatenate([params["wpred_f"], params["wpred_b"]],
                            axis=0)                                   # (2H, 1)
    return wih, whh, bias, wpred, params["bpred"], params["emb"]


@functools.partial(jax.jit, static_argnames=())
def simple_lstm_forward(tokens, params):
    wih, whh, bias, wpred, bpred, emb_table = _pack_params(params)
    B, T = tokens.shape

    # pad batch to a multiple of 8 (f32 sublane count) with all-PAD rows
    Bp = max(8, -(-B // 8) * 8)
    tok_p = jnp.pad(tokens, ((0, Bp - B), (0, 0)), constant_values=PAD_IDX)

    emb = emb_table[tok_p].astype(jnp.float32)                        # (Bp, T, E)
    lengths = jnp.sum(tok_p != PAD_IDX, axis=1).astype(jnp.int32)     # (Bp,)
    ismax = (lengths == jnp.max(lengths)).astype(jnp.float32)[:, None]

    # time-major, flattened to 2D so the kernel's hoisted input projection is
    # one well-shaped matmul and per-step slices are sublane-aligned.
    emb_tm = jnp.transpose(emb, (1, 0, 2)).reshape(T * Bp, -1)        # (T*Bp, E)

    pred = _run_bilstm_kernel(emb_tm, lengths[:, None], ismax,
                              wih, whh, bias, wpred, bpred)
    return pred[:B]


# ---------------------------------------------------------------------------
# Pure-JAX reference (original packed-sequence semantics, unfused weights)
# ---------------------------------------------------------------------------
def reference_forward(tokens, params):
    emb_table = params["emb"]
    emb = emb_table[tokens]
    B, T = tokens.shape
    H = params["whh_f"].shape[0]

    lengths = jnp.sum(tokens != PAD_IDX, axis=1)
    t_idx = jnp.arange(T)
    mask = (t_idx[None, :] < lengths[:, None]).astype(jnp.float32)
    rev_idx = jnp.clip(lengths[:, None] - 1 - t_idx[None, :], 0, T - 1)
    emb_rev = jnp.take_along_axis(emb, rev_idx[:, :, None], axis=1)

    def cell(x, h, c, wih, whh, b):
        g = x @ wih + h @ whh + b
        i_g = jax.nn.sigmoid(g[:, 0 * H:1 * H])
        f_g = jax.nn.sigmoid(g[:, 1 * H:2 * H])
        g_g = jnp.tanh(g[:, 2 * H:3 * H])
        o_g = jax.nn.sigmoid(g[:, 3 * H:4 * H])
        c_new = f_g * c + i_g * g_g
        return o_g * jnp.tanh(c_new), c_new

    h_f = c_f = h_b = c_b = jnp.zeros((B, H), jnp.float32)
    for t in range(T):
        m = mask[:, t:t + 1]
        hf_n, cf_n = cell(emb[:, t], h_f, c_f,
                          params["wih_f"], params["whh_f"], params["b_f"])
        hb_n, cb_n = cell(emb_rev[:, t], h_b, c_b,
                          params["wih_b"], params["whh_b"], params["b_b"])
        h_f = m * hf_n + (1 - m) * h_f
        c_f = m * cf_n + (1 - m) * c_f
        h_b = m * hb_n + (1 - m) * h_b
        c_b = m * cb_n + (1 - m) * c_b

    ismax = (lengths == jnp.max(lengths)).astype(jnp.float32)[:, None]
    out_fwd = ismax * h_f
    return out_fwd @ params["wpred_f"] + h_b @ params["wpred_b"] + params["bpred"]


# ---------------------------------------------------------------------------
# Deterministic parameter initialisation (mirrors module __init__ shapes)
# ---------------------------------------------------------------------------
def init_params(key, vocab_size, emb_dim, hidden_dim):
    H = hidden_dim
    ks = jax.random.split(key, 12)
    initrange = 0.1
    stdv = 1.0 / np.sqrt(H)

    emb = jax.random.uniform(ks[0], (vocab_size, emb_dim),
                             minval=-initrange, maxval=initrange,
                             dtype=jnp.float32)
    emb = emb.at[PAD_IDX].set(0.0)   # padding_idx row

    def u(k, shape, s):
        return jax.random.uniform(k, shape, minval=-s, maxval=s,
                                  dtype=jnp.float32)

    # stored transposed relative to PyTorch: (in, 4H) so kernel does x @ W
    wih_f = u(ks[1], (emb_dim, 4 * H), stdv)
    whh_f = u(ks[2], (H, 4 * H), stdv)
    b_f = u(ks[3], (1, 4 * H), stdv) + u(ks[4], (1, 4 * H), stdv)   # b_ih + b_hh
    wih_b = u(ks[5], (emb_dim, 4 * H), stdv)
    whh_b = u(ks[6], (H, 4 * H), stdv)
    b_b = u(ks[7], (1, 4 * H), stdv) + u(ks[8], (1, 4 * H), stdv)   # b_ih + b_hh

    wpred = u(ks[9], (1, 2 * H), initrange)   # torch Linear weight (1, 2H)
    wpred_f = wpred[:, :H].T                  # (H, 1)
    wpred_b = wpred[:, H:].T                  # (H, 1)
    bpred = jnp.zeros((1, 1), jnp.float32)

    return dict(emb=emb, wih_f=wih_f, whh_f=whh_f, b_f=b_f,
                wih_b=wih_b, whh_b=whh_b, b_b=b_b,
                wpred_f=wpred_f, wpred_b=wpred_b, bpred=bpred)


if __name__ == "__main__":
    B, T = 2, 8
    EMB_DIM, HIDDEN_DIM, VOCAB = 16, 32, 20

    key = jax.random.PRNGKey(0)
    k_tok, k_par = jax.random.split(key)

    # tokens in [1, VOCAB), with trailing padding (pad_idx = 0) of varying length
    tokens = jax.random.randint(k_tok, (B, T), 1, VOCAB, dtype=jnp.int32)
    lengths = jnp.array([T, T - 3], dtype=jnp.int32)
    valid = jnp.arange(T)[None, :] < lengths[:, None]
    tokens = jnp.where(valid, tokens, PAD_IDX)

    params = init_params(k_par, VOCAB, EMB_DIM, HIDDEN_DIM)

    pred = simple_lstm_forward(tokens, params)
    pred = jax.block_until_ready(pred)

    ref = reference_forward(tokens, params)
    np.testing.assert_allclose(np.asarray(pred), np.asarray(ref),
                               atol=2e-4, rtol=2e-4)
    assert pred.shape == (B, 1)
    print("KERNEL_OK")
</pallas_src>

<mosaic_0001>
module attributes {stable_mosaic.version = 11 : i64} {
  func.func @_bilstm_kernel(%arg0: memref<64x16xf32, #tpu.memory_space<vmem>>, %arg1: memref<8x1xi32, #tpu.memory_space<vmem>>, %arg2: memref<8x1xf32, #tpu.memory_space<vmem>>, %arg3: memref<16x256xf32, #tpu.memory_space<vmem>>, %arg4: memref<64x256xf32, #tpu.memory_space<vmem>>, %arg5: memref<1x256xf32, #tpu.memory_space<vmem>>, %arg6: memref<64x1xf32, #tpu.memory_space<vmem>>, %arg7: memref<1x1xf32, #tpu.memory_space<vmem>>, %arg8: memref<8x1xf32, #tpu.memory_space<vmem>>) attributes {dimension_semantics = [], scalar_prefetch = 0 : i64, scratch_operands = 0 : i64, tpu.core_type = #tpu.core_type<tc>} {
    %c0 = arith.constant 0 : index
    %c0_0 = arith.constant 0 : index
    %0 = vector.load %arg0[%c0, %c0_0] : memref<64x16xf32, #tpu.memory_space<vmem>>, vector<64x16xf32>
    %c0_1 = arith.constant 0 : index
    %c0_2 = arith.constant 0 : index
    %1 = vector.load %arg3[%c0_1, %c0_2] : memref<16x256xf32, #tpu.memory_space<vmem>>, vector<16x256xf32>
    %cst = arith.constant dense<0.000000e+00> : vector<64x256xf32>
    %2 = tpu.matmul %0, %1, %cst {dimension_numbers = #tpu.dot_dimension_numbers<[1], [0], [0], [1], [0, 0, 1, 1], [], []>} : vector<64x16xf32>, vector<16x256xf32>, vector<64x256xf32> -> vector<64x256xf32>
    %c0_3 = arith.constant 0 : index
    %c0_4 = arith.constant 0 : index
    %3 = vector.load %arg5[%c0_3, %c0_4] : memref<1x256xf32, #tpu.memory_space<vmem>>, vector<1x256xf32>
    %4 = vector.broadcast %3 : vector<1x256xf32> to vector<64x256xf32>
    %5 = arith.addf %2, %4 : vector<64x256xf32>
    %c0_5 = arith.constant 0 : index
    %c0_6 = arith.constant 0 : index
    %6 = vector.load %arg4[%c0_5, %c0_6] : memref<64x256xf32, #tpu.memory_space<vmem>>, vector<64x256xf32>
    %c0_7 = arith.constant 0 : index
    %c0_8 = arith.constant 0 : index
    %7 = vector.load %arg1[%c0_7, %c0_8] : memref<8x1xi32, #tpu.memory_space<vmem>>, vector<8x1xi32>
    %8 = tpu.iota {dimensions = array<i32: 1>} : vector<1x256xi32>
    %c64_i32 = arith.constant 64 : i32
    %c0_i32 = arith.constant 0 : i32
    %9 = arith.cmpi eq, %c64_i32, %c0_i32 : i32
    %c1_i32 = arith.constant 1 : i32
    %10 = arith.select %9, %c1_i32, %c64_i32 : i32
    %11 = vector.broadcast %10 : i32 to vector<1x256xi32>
    %12 = arith.remsi %8, %11 : vector<1x256xi32>
    %c0_i32_9 = arith.constant 0 : i32
    %13 = vector.broadcast %c0_i32_9 : i32 to vector<1x256xi32>
    %14 = arith.cmpi ne, %12, %13 : vector<1x256xi32>
    %c0_i32_10 = arith.constant 0 : i32
    %15 = vector.broadcast %c0_i32_10 : i32 to vector<1x256xi32>
    %16 = arith.cmpi slt, %12, %15 : vector<1x256xi32>
    %c0_i32_11 = arith.constant 0 : i32
    %17 = arith.cmpi slt, %10, %c0_i32_11 : i32
    %18 = vector.broadcast %17 : i1 to vector<1x256xi1>
    %19 = vector.broadcast %18 : vector<1x256xi1> to vector<1x256xi1>
    %20 = arith.xori %16, %19 : vector<1x256xi1>
    %21 = arith.andi %20, %14 : vector<1x256xi1>
    %22 = vector.broadcast %10 : i32 to vector<1x256xi32>
    %23 = arith.addi %12, %22 : vector<1x256xi32>
    %24 = arith.select %21, %23, %12 : vector<1x256xi1>, vector<1x256xi32>
    %c32_i32 = arith.constant 32 : i32
    %25 = vector.broadcast %c32_i32 : i32 to vector<1x256xi32>
    %26 = arith.cmpi slt, %24, %25 : vector<1x256xi32>
    %c128_i32 = arith.constant 128 : i32
    %27 = vector.broadcast %c128_i32 : i32 to vector<1x256xi32>
    %28 = arith.cmpi sge, %8, %27 : vector<1x256xi32>
    %c192_i32 = arith.constant 192 : i32
    %29 = vector.broadcast %c192_i32 : i32 to vector<1x256xi32>
    %30 = arith.cmpi slt, %8, %29 : vector<1x256xi32>
    %31 = arith.andi %28, %30 : vector<1x256xi1>
    %32 = tpu.iota {dimensions = array<i32: 1>} : vector<1x64xi32>
    %c32_i32_12 = arith.constant 32 : i32
    %33 = vector.broadcast %c32_i32_12 : i32 to vector<1x64xi32>
    %34 = arith.cmpi slt, %32, %33 : vector<1x64xi32>
    %cst_13 = arith.constant 0.000000e+00 : f32
    %35 = vector.broadcast %cst_13 : f32 to vector<8x64xf32>
    %cst_14 = arith.constant 0.000000e+00 : f32
    %36 = vector.broadcast %cst_14 : f32 to vector<8x64xf32>
    %37 = vector.extract_strided_slice %5 {offsets = [0, 0], sizes = [8, 256], strides = [1, 1]} : vector<64x256xf32> to vector<8x256xf32>
    %38 = vector.extract_strided_slice %5 {offsets = [56, 0], sizes = [8, 256], strides = [1, 1]} : vector<64x256xf32> to vector<8x256xf32>
    %39 = vector.shape_cast %26 : vector<1x256xi1> to vector<1x256xi1>
    %40 = vector.broadcast %39 : vector<1x256xi1> to vector<8x256xi1>
    %41 = arith.select %40, %37, %38 : vector<8x256xi1>, vector<8x256xf32>
    %cst_15 = arith.constant dense<0.000000e+00> : vector<8x256xf32>
    %42 = tpu.matmul %35, %6, %cst_15 {dimension_numbers = #tpu.dot_dimension_numbers<[1], [0], [0], [1], [0, 0, 1, 1], [], []>} : vector<8x64xf32>, vector<64x256xf32>, vector<8x256xf32> -> vector<8x256xf32>
    %43 = arith.addf %41, %42 : vector<8x256xf32>
    %cst_16 = arith.constant 5.000000e-01 : f32
    %44 = vector.broadcast %cst_16 : f32 to vector<8x256xf32>
    %45 = arith.mulf %44, %43 : vector<8x256xf32>
    %46 = vector.shape_cast %31 : vector<1x256xi1> to vector<1x256xi1>
    %47 = vector.broadcast %46 : vector<1x256xi1> to vector<8x256xi1>
    %48 = arith.select %47, %43, %45 : vector<8x256xi1>, vector<8x256xf32>
    %49 = math.tanh %48 : vector<8x256xf32>
    %cst_17 = arith.constant 5.000000e-01 : f32
    %50 = vector.broadcast %cst_17 : f32 to vector<8x256xf32>
    %51 = arith.mulf %50, %49 : vector<8x256xf32>
    %cst_18 = arith.constant 5.000000e-01 : f32
    %52 = vector.broadcast %cst_18 : f32 to vector<8x256xf32>
    %53 = arith.addf %51, %52 : vector<8x256xf32>
    %54 = vector.shape_cast %31 : vector<1x256xi1> to vector<1x256xi1>
    %55 = vector.broadcast %54 : vector<1x256xi1> to vector<8x256xi1>
    %56 = arith.select %55, %49, %53 : vector<8x256xi1>, vector<8x256xf32>
    %57 = vector.extract_strided_slice %56 {offsets = [0, 0], sizes = [8, 64], strides = [1, 1]} : vector<8x256xf32> to vector<8x64xf32>
    %58 = vector.extract_strided_slice %56 {offsets = [0, 64], sizes = [8, 64], strides = [1, 1]} : vector<8x256xf32> to vector<8x64xf32>
    %59 = vector.extract_strided_slice %56 {offsets = [0, 128], sizes = [8, 64], strides = [1, 1]} : vector<8x256xf32> to vector<8x64xf32>
    %60 = vector.extract_strided_slice %56 {offsets = [0, 192], sizes = [8, 64], strides = [1, 1]} : vector<8x256xf32> to vector<8x64xf32>
    %61 = arith.mulf %58, %36 : vector<8x64xf32>
    %62 = arith.mulf %57, %59 : vector<8x64xf32>
    %63 = arith.addf %61, %62 : vector<8x64xf32>
    %64 = math.tanh %63 : vector<8x64xf32>
    %65 = arith.mulf %60, %64 : vector<8x64xf32>
    %c0_i32_19 = arith.constant 0 : i32
    %c7_i32 = arith.constant 7 : i32
    %66 = vector.broadcast %c0_i32_19 : i32 to vector<1x64xi32>
    %67 = vector.broadcast %c7_i32 : i32 to vector<1x64xi32>
    %68 = arith.select %34, %66, %67 : vector<1x64xi1>, vector<1x64xi32>
    %69 = vector.broadcast %68 : vector<1x64xi32> to vector<8x64xi32>
    %70 = vector.broadcast %7 : vector<8x1xi32> to vector<8x64xi32>
    %71 = arith.cmpi slt, %69, %70 : vector<8x64xi32>
    %72 = arith.select %71, %65, %35 : vector<8x64xi1>, vector<8x64xf32>
    %73 = arith.select %71, %63, %36 : vector<8x64xi1>, vector<8x64xf32>
    %74 = vector.extract_strided_slice %5 {offsets = [8, 0], sizes = [8, 256], strides = [1, 1]} : vector<64x256xf32> to vector<8x256xf32>
    %75 = vector.extract_strided_slice %5 {offsets = [48, 0], sizes = [8, 256], strides = [1, 1]} : vector<64x256xf32> to vector<8x256xf32>
    %76 = vector.shape_cast %26 : vector<1x256xi1> to vector<1x256xi1>
    %77 = vector.broadcast %76 : vector<1x256xi1> to vector<8x256xi1>
    %78 = arith.select %77, %74, %75 : vector<8x256xi1>, vector<8x256xf32>
    %cst_20 = arith.constant dense<0.000000e+00> : vector<8x256xf32>
    %79 = tpu.matmul %72, %6, %cst_20 {dimension_numbers = #tpu.dot_dimension_numbers<[1], [0], [0], [1], [0, 0, 1, 1], [], []>} : vector<8x64xf32>, vector<64x256xf32>, vector<8x256xf32> -> vector<8x256xf32>
    %80 = arith.addf %78, %79 : vector<8x256xf32>
    %cst_21 = arith.constant 5.000000e-01 : f32
    %81 = vector.broadcast %cst_21 : f32 to vector<8x256xf32>
    %82 = arith.mulf %81, %80 : vector<8x256xf32>
    %83 = vector.shape_cast %31 : vector<1x256xi1> to vector<1x256xi1>
    %84 = vector.broadcast %83 : vector<1x256xi1> to vector<8x256xi1>
    %85 = arith.select %84, %80, %82 : vector<8x256xi1>, vector<8x256xf32>
    %86 = math.tanh %85 : vector<8x256xf32>
    %cst_22 = arith.constant 5.000000e-01 : f32
    %87 = vector.broadcast %cst_22 : f32 to vector<8x256xf32>
    %88 = arith.mulf %87, %86 : vector<8x256xf32>
    %cst_23 = arith.constant 5.000000e-01 : f32
    %89 = vector.broadcast %cst_23 : f32 to vector<8x256xf32>
    %90 = arith.addf %88, %89 : vector<8x256xf32>
    %91 = vector.shape_cast %31 : vector<1x256xi1> to vector<1x256xi1>
    %92 = vector.broadcast %91 : vector<1x256xi1> to vector<8x256xi1>
    %93 = arith.select %92, %86, %90 : vector<8x256xi1>, vector<8x256xf32>
    %94 = vector.extract_strided_slice %93 {offsets = [0, 0], sizes = [8, 64], strides = [1, 1]} : vector<8x256xf32> to vector<8x64xf32>
    %95 = vector.extract_strided_slice %93 {offsets = [0, 64], sizes = [8, 64], strides = [1, 1]} : vector<8x256xf32> to vector<8x64xf32>
    %96 = vector.extract_strided_slice %93 {offsets = [0, 128], sizes = [8, 64], strides = [1, 1]} : vector<8x256xf32> to vector<8x64xf32>
    %97 = vector.extract_strided_slice %93 {offsets = [0, 192], sizes = [8, 64], strides = [1, 1]} : vector<8x256xf32> to vector<8x64xf32>
    %98 = arith.mulf %95, %73 : vector<8x64xf32>
    %99 = arith.mulf %94, %96 : vector<8x64xf32>
    %100 = arith.addf %98, %99 : vector<8x64xf32>
    %101 = math.tanh %100 : vector<8x64xf32>
    %102 = arith.mulf %97, %101 : vector<8x64xf32>
    %c1_i32_24 = arith.constant 1 : i32
    %c6_i32 = arith.constant 6 : i32
    %103 = vector.broadcast %c1_i32_24 : i32 to vector<1x64xi32>
    %104 = vector.broadcast %c6_i32 : i32 to vector<1x64xi32>
    %105 = arith.select %34, %103, %104 : vector<1x64xi1>, vector<1x64xi32>
    %106 = vector.broadcast %105 : vector<1x64xi32> to vector<8x64xi32>
    %107 = vector.broadcast %7 : vector<8x1xi32> to vector<8x64xi32>
    %108 = arith.cmpi slt, %106, %107 : vector<8x64xi32>
    %109 = arith.select %108, %102, %72 : vector<8x64xi1>, vector<8x64xf32>
    %110 = arith.select %108, %100, %73 : vector<8x64xi1>, vector<8x64xf32>
    %111 = vector.extract_strided_slice %5 {offsets = [16, 0], sizes = [8, 256], strides = [1, 1]} : vector<64x256xf32> to vector<8x256xf32>
    %112 = vector.extract_strided_slice %5 {offsets = [40, 0], sizes = [8, 256], strides = [1, 1]} : vector<64x256xf32> to vector<8x256xf32>
    %113 = vector.shape_cast %26 : vector<1x256xi1> to vector<1x256xi1>
    %114 = vector.broadcast %113 : vector<1x256xi1> to vector<8x256xi1>
    %115 = arith.select %114, %111, %112 : vector<8x256xi1>, vector<8x256xf32>
    %cst_25 = arith.constant dense<0.000000e+00> : vector<8x256xf32>
    %116 = tpu.matmul %109, %6, %cst_25 {dimension_numbers = #tpu.dot_dimension_numbers<[1], [0], [0], [1], [0, 0, 1, 1], [], []>} : vector<8x64xf32>, vector<64x256xf32>, vector<8x256xf32> -> vector<8x256xf32>
    %117 = arith.addf %115, %116 : vector<8x256xf32>
    %cst_26 = arith.constant 5.000000e-01 : f32
    %118 = vector.broadcast %cst_26 : f32 to vector<8x256xf32>
    %119 = arith.mulf %118, %117 : vector<8x256xf32>
    %120 = vector.shape_cast %31 : vector<1x256xi1> to vector<1x256xi1>
    %121 = vector.broadcast %120 : vector<1x256xi1> to vector<8x256xi1>
    %122 = arith.select %121, %117, %119 : vector<8x256xi1>, vector<8x256xf32>
    %123 = math.tanh %122 : vector<8x256xf32>
    %cst_27 = arith.constant 5.000000e-01 : f32
    %124 = vector.broadcast %cst_27 : f32 to vector<8x256xf32>
    %125 = arith.mulf %124, %123 : vector<8x256xf32>
    %cst_28 = arith.constant 5.000000e-01 : f32
    %126 = vector.broadcast %cst_28 : f32 to vector<8x256xf32>
    %127 = arith.addf %125, %126 : vector<8x256xf32>
    %128 = vector.shape_cast %31 : vector<1x256xi1> to vector<1x256xi1>
    %129 = vector.broadcast %128 : vector<1x256xi1> to vector<8x256xi1>
    %130 = arith.select %129, %123, %127 : vector<8x256xi1>, vector<8x256xf32>
    %131 = vector.extract_strided_slice %130 {offsets = [0, 0], sizes = [8, 64], strides = [1, 1]} : vector<8x256xf32> to vector<8x64xf32>
    %132 = vector.extract_strided_slice %130 {offsets = [0, 64], sizes = [8, 64], strides = [1, 1]} : vector<8x256xf32> to vector<8x64xf32>
    %133 = vector.extract_strided_slice %130 {offsets = [0, 128], sizes = [8, 64], strides = [1, 1]} : vector<8x256xf32> to vector<8x64xf32>
    %134 = vector.extract_strided_slice %130 {offsets = [0, 192], sizes = [8, 64], strides = [1, 1]} : vector<8x256xf32> to vector<8x64xf32>
    %135 = arith.mulf %132, %110 : vector<8x64xf32>
    %136 = arith.mulf %131, %133 : vector<8x64xf32>
    %137 = arith.addf %135, %136 : vector<8x64xf32>
    %138 = math.tanh %137 : vector<8x64xf32>
    %139 = arith.mulf %134, %138 : vector<8x64xf32>
    %c2_i32 = arith.constant 2 : i32
    %c5_i32 = arith.constant 5 : i32
    %140 = vector.broadcast %c2_i32 : i32 to vector<1x64xi32>
    %141 = vector.broadcast %c5_i32 : i32 to vector<1x64xi32>
    %142 = arith.select %34, %140, %141 : vector<1x64xi1>, vector<1x64xi32>
    %143 = vector.broadcast %142 : vector<1x64xi32> to vector<8x64xi32>
    %144 = vector.broadcast %7 : vector<8x1xi32> to vector<8x64xi32>
    %145 = arith.cmpi slt, %143, %144 : vector<8x64xi32>
    %146 = arith.select %145, %139, %109 : vector<8x64xi1>, vector<8x64xf32>
    %147 = arith.select %145, %137, %110 : vector<8x64xi1>, vector<8x64xf32>
    %148 = vector.extract_strided_slice %5 {offsets = [24, 0], sizes = [8, 256], strides = [1, 1]} : vector<64x256xf32> to vector<8x256xf32>
    %149 = vector.extract_strided_slice %5 {offsets = [32, 0], sizes = [8, 256], strides = [1, 1]} : vector<64x256xf32> to vector<8x256xf32>
    %150 = vector.shape_cast %26 : vector<1x256xi1> to vector<1x256xi1>
    %151 = vector.broadcast %150 : vector<1x256xi1> to vector<8x256xi1>
    %152 = arith.select %151, %148, %149 : vector<8x256xi1>, vector<8x256xf32>
    %cst_29 = arith.constant dense<0.000000e+00> : vector<8x256xf32>
    %153 = tpu.matmul %146, %6, %cst_29 {dimension_numbers = #tpu.dot_dimension_numbers<[1], [0], [0], [1], [0, 0, 1, 1], [], []>} : vector<8x64xf32>, vector<64x256xf32>, vector<8x256xf32> -> vector<8x256xf32>
    %154 = arith.addf %152, %153 : vector<8x256xf32>
    %cst_30 = arith.constant 5.000000e-01 : f32
    %155 = vector.broadcast %cst_30 : f32 to vector<8x256xf32>
    %156 = arith.mulf %155, %154 : vector<8x256xf32>
    %157 = vector.shape_cast %31 : vector<1x256xi1> to vector<1x256xi1>
    %158 = vector.broadcast %157 : vector<1x256xi1> to vector<8x256xi1>
    %159 = arith.select %158, %154, %156 : vector<8x256xi1>, vector<8x256xf32>
    %160 = math.tanh %159 : vector<8x256xf32>
    %cst_31 = arith.constant 5.000000e-01 : f32
    %161 = vector.broadcast %cst_31 : f32 to vector<8x256xf32>
    %162 = arith.mulf %161, %160 : vector<8x256xf32>
    %cst_32 = arith.constant 5.000000e-01 : f32
    %163 = vector.broadcast %cst_32 : f32 to vector<8x256xf32>
    %164 = arith.addf %162, %163 : vector<8x256xf32>
    %165 = vector.shape_cast %31 : vector<1x256xi1> to vector<1x256xi1>
    %166 = vector.broadcast %165 : vector<1x256xi1> to vector<8x256xi1>
    %167 = arith.select %166, %160, %164 : vector<8x256xi1>, vector<8x256xf32>
    %168 = vector.extract_strided_slice %167 {offsets = [0, 0], sizes = [8, 64], strides = [1, 1]} : vector<8x256xf32> to vector<8x64xf32>
    %169 = vector.extract_strided_slice %167 {offsets = [0, 64], sizes = [8, 64], strides = [1, 1]} : vector<8x256xf32> to vector<8x64xf32>
    %170 = vector.extract_strided_slice %167 {offsets = [0, 128], sizes = [8, 64], strides = [1, 1]} : vector<8x256xf32> to vector<8x64xf32>
    %171 = vector.extract_strided_slice %167 {offsets = [0, 192], sizes = [8, 64], strides = [1, 1]} : vector<8x256xf32> to vector<8x64xf32>
    %172 = arith.mulf %169, %147 : vector<8x64xf32>
    %173 = arith.mulf %168, %170 : vector<8x64xf32>
    %174 = arith.addf %172, %173 : vector<8x64xf32>
    %175 = math.tanh %174 : vector<8x64xf32>
    %176 = arith.mulf %171, %175 : vector<8x64xf32>
    %c3_i32 = arith.constant 3 : i32
    %c4_i32 = arith.constant 4 : i32
    %177 = vector.broadcast %c3_i32 : i32 to vector<1x64xi32>
    %178 = vector.broadcast %c4_i32 : i32 to vector<1x64xi32>
    %179 = arith.select %34, %177, %178 : vector<1x64xi1>, vector<1x64xi32>
    %180 = vector.broadcast %179 : vector<1x64xi32> to vector<8x64xi32>
    %181 = vector.broadcast %7 : vector<8x1xi32> to vector<8x64xi32>
    %182 = arith.cmpi slt, %180, %181 : vector<8x64xi32>
    %183 = arith.select %182, %176, %146 : vector<8x64xi1>, vector<8x64xf32>
    %184 = arith.select %182, %174, %147 : vector<8x64xi1>, vector<8x64xf32>
    %185 = vector.extract_strided_slice %5 {offsets = [32, 0], sizes = [8, 256], strides = [1, 1]} : vector<64x256xf32> to vector<8x256xf32>
    %186 = vector.extract_strided_slice %5 {offsets = [24, 0], sizes = [8, 256], strides = [1, 1]} : vector<64x256xf32> to vector<8x256xf32>
    %187 = vector.shape_cast %26 : vector<1x256xi1> to vector<1x256xi1>
    %188 = vector.broadcast %187 : vector<1x256xi1> to vector<8x256xi1>
    %189 = arith.select %188, %185, %186 : vector<8x256xi1>, vector<8x256xf32>
    %cst_33 = arith.constant dense<0.000000e+00> : vector<8x256xf32>
    %190 = tpu.matmul %183, %6, %cst_33 {dimension_numbers = #tpu.dot_dimension_numbers<[1], [0], [0], [1], [0, 0, 1, 1], [], []>} : vector<8x64xf32>, vector<64x256xf32>, vector<8x256xf32> -> vector<8x256xf32>
    %191 = arith.addf %189, %190 : vector<8x256xf32>
    %cst_34 = arith.constant 5.000000e-01 : f32
    %192 = vector.broadcast %cst_34 : f32 to vector<8x256xf32>
    %193 = arith.mulf %192, %191 : vector<8x256xf32>
    %194 = vector.shape_cast %31 : vector<1x256xi1> to vector<1x256xi1>
    %195 = vector.broadcast %194 : vector<1x256xi1> to vector<8x256xi1>
    %196 = arith.select %195, %191, %193 : vector<8x256xi1>, vector<8x256xf32>
    %197 = math.tanh %196 : vector<8x256xf32>
    %cst_35 = arith.constant 5.000000e-01 : f32
    %198 = vector.broadcast %cst_35 : f32 to vector<8x256xf32>
    %199 = arith.mulf %198, %197 : vector<8x256xf32>
    %cst_36 = arith.constant 5.000000e-01 : f32
    %200 = vector.broadcast %cst_36 : f32 to vector<8x256xf32>
    %201 = arith.addf %199, %200 : vector<8x256xf32>
    %202 = vector.shape_cast %31 : vector<1x256xi1> to vector<1x256xi1>
    %203 = vector.broadcast %202 : vector<1x256xi1> to vector<8x256xi1>
    %204 = arith.select %203, %197, %201 : vector<8x256xi1>, vector<8x256xf32>
    %205 = vector.extract_strided_slice %204 {offsets = [0, 0], sizes = [8, 64], strides = [1, 1]} : vector<8x256xf32> to vector<8x64xf32>
    %206 = vector.extract_strided_slice %204 {offsets = [0, 64], sizes = [8, 64], strides = [1, 1]} : vector<8x256xf32> to vector<8x64xf32>
    %207 = vector.extract_strided_slice %204 {offsets = [0, 128], sizes = [8, 64], strides = [1, 1]} : vector<8x256xf32> to vector<8x64xf32>
    %208 = vector.extract_strided_slice %204 {offsets = [0, 192], sizes = [8, 64], strides = [1, 1]} : vector<8x256xf32> to vector<8x64xf32>
    %209 = arith.mulf %206, %184 : vector<8x64xf32>
    %210 = arith.mulf %205, %207 : vector<8x64xf32>
    %211 = arith.addf %209, %210 : vector<8x64xf32>
    %212 = math.tanh %211 : vector<8x64xf32>
    %213 = arith.mulf %208, %212 : vector<8x64xf32>
    %c4_i32_37 = arith.constant 4 : i32
    %c3_i32_38 = arith.constant 3 : i32
    %214 = vector.broadcast %c4_i32_37 : i32 to vector<1x64xi32>
    %215 = vector.broadcast %c3_i32_38 : i32 to vector<1x64xi32>
    %216 = arith.select %34, %214, %215 : vector<1x64xi1>, vector<1x64xi32>
    %217 = vector.broadcast %216 : vector<1x64xi32> to vector<8x64xi32>
    %218 = vector.broadcast %7 : vector<8x1xi32> to vector<8x64xi32>
    %219 = arith.cmpi slt, %217, %218 : vector<8x64xi32>
    %220 = arith.select %219, %213, %183 : vector<8x64xi1>, vector<8x64xf32>
    %221 = arith.select %219, %211, %184 : vector<8x64xi1>, vector<8x64xf32>
    %222 = vector.extract_strided_slice %5 {offsets = [40, 0], sizes = [8, 256], strides = [1, 1]} : vector<64x256xf32> to vector<8x256xf32>
    %223 = vector.extract_strided_slice %5 {offsets = [16, 0], sizes = [8, 256], strides = [1, 1]} : vector<64x256xf32> to vector<8x256xf32>
    %224 = vector.shape_cast %26 : vector<1x256xi1> to vector<1x256xi1>
    %225 = vector.broadcast %224 : vector<1x256xi1> to vector<8x256xi1>
    %226 = arith.select %225, %222, %223 : vector<8x256xi1>, vector<8x256xf32>
    %cst_39 = arith.constant dense<0.000000e+00> : vector<8x256xf32>
    %227 = tpu.matmul %220, %6, %cst_39 {dimension_numbers = #tpu.dot_dimension_numbers<[1], [0], [0], [1], [0, 0, 1, 1], [], []>} : vector<8x64xf32>, vector<64x256xf32>, vector<8x256xf32> -> vector<8x256xf32>
    %228 = arith.addf %226, %227 : vector<8x256xf32>
    %cst_40 = arith.constant 5.000000e-01 : f32
    %229 = vector.broadcast %cst_40 : f32 to vector<8x256xf32>
    %230 = arith.mulf %229, %228 : vector<8x256xf32>
    %231 = vector.shape_cast %31 : vector<1x256xi1> to vector<1x256xi1>
    %232 = vector.broadcast %231 : vector<1x256xi1> to vector<8x256xi1>
    %233 = arith.select %232, %228, %230 : vector<8x256xi1>, vector<8x256xf32>
    %234 = math.tanh %233 : vector<8x256xf32>
    %cst_41 = arith.constant 5.000000e-01 : f32
    %235 = vector.broadcast %cst_41 : f32 to vector<8x256xf32>
    %236 = arith.mulf %235, %234 : vector<8x256xf32>
    %cst_42 = arith.constant 5.000000e-01 : f32
    %237 = vector.broadcast %cst_42 : f32 to vector<8x256xf32>
    %238 = arith.addf %236, %237 : vector<8x256xf32>
    %239 = vector.shape_cast %31 : vector<1x256xi1> to vector<1x256xi1>
    %240 = vector.broadcast %239 : vector<1x256xi1> to vector<8x256xi1>
    %241 = arith.select %240, %234, %238 : vector<8x256xi1>, vector<8x256xf32>
    %242 = vector.extract_strided_slice %241 {offsets = [0, 0], sizes = [8, 64], strides = [1, 1]} : vector<8x256xf32> to vector<8x64xf32>
    %243 = vector.extract_strided_slice %241 {offsets = [0, 64], sizes = [8, 64], strides = [1, 1]} : vector<8x256xf32> to vector<8x64xf32>
    %244 = vector.extract_strided_slice %241 {offsets = [0, 128], sizes = [8, 64], strides = [1, 1]} : vector<8x256xf32> to vector<8x64xf32>
    %245 = vector.extract_strided_slice %241 {offsets = [0, 192], sizes = [8, 64], strides = [1, 1]} : vector<8x256xf32> to vector<8x64xf32>
    %246 = arith.mulf %243, %221 : vector<8x64xf32>
    %247 = arith.mulf %242, %244 : vector<8x64xf32>
    %248 = arith.addf %246, %247 : vector<8x64xf32>
    %249 = math.tanh %248 : vector<8x64xf32>
    %250 = arith.mulf %245, %249 : vector<8x64xf32>
    %c5_i32_43 = arith.constant 5 : i32
    %c2_i32_44 = arith.constant 2 : i32
    %251 = vector.broadcast %c5_i32_43 : i32 to vector<1x64xi32>
    %252 = vector.broadcast %c2_i32_44 : i32 to vector<1x64xi32>
    %253 = arith.select %34, %251, %252 : vector<1x64xi1>, vector<1x64xi32>
    %254 = vector.broadcast %253 : vector<1x64xi32> to vector<8x64xi32>
    %255 = vector.broadcast %7 : vector<8x1xi32> to vector<8x64xi32>
    %256 = arith.cmpi slt, %254, %255 : vector<8x64xi32>
    %257 = arith.select %256, %250, %220 : vector<8x64xi1>, vector<8x64xf32>
    %258 = arith.select %256, %248, %221 : vector<8x64xi1>, vector<8x64xf32>
    %259 = vector.extract_strided_slice %5 {offsets = [48, 0], sizes = [8, 256], strides = [1, 1]} : vector<64x256xf32> to vector<8x256xf32>
    %260 = vector.extract_strided_slice %5 {offsets = [8, 0], sizes = [8, 256], strides = [1, 1]} : vector<64x256xf32> to vector<8x256xf32>
    %261 = vector.shape_cast %26 : vector<1x256xi1> to vector<1x256xi1>
    %262 = vector.broadcast %261 : vector<1x256xi1> to vector<8x256xi1>
    %263 = arith.select %262, %259, %260 : vector<8x256xi1>, vector<8x256xf32>
    %cst_45 = arith.constant dense<0.000000e+00> : vector<8x256xf32>
    %264 = tpu.matmul %257, %6, %cst_45 {dimension_numbers = #tpu.dot_dimension_numbers<[1], [0], [0], [1], [0, 0, 1, 1], [], []>} : vector<8x64xf32>, vector<64x256xf32>, vector<8x256xf32> -> vector<8x256xf32>
    %265 = arith.addf %263, %264 : vector<8x256xf32>
    %cst_46 = arith.constant 5.000000e-01 : f32
    %266 = vector.broadcast %cst_46 : f32 to vector<8x256xf32>
    %267 = arith.mulf %266, %265 : vector<8x256xf32>
    %268 = vector.shape_cast %31 : vector<1x256xi1> to vector<1x256xi1>
    %269 = vector.broadcast %268 : vector<1x256xi1> to vector<8x256xi1>
    %270 = arith.select %269, %265, %267 : vector<8x256xi1>, vector<8x256xf32>
    %271 = math.tanh %270 : vector<8x256xf32>
    %cst_47 = arith.constant 5.000000e-01 : f32
    %272 = vector.broadcast %cst_47 : f32 to vector<8x256xf32>
    %273 = arith.mulf %272, %271 : vector<8x256xf32>
    %cst_48 = arith.constant 5.000000e-01 : f32
    %274 = vector.broadcast %cst_48 : f32 to vector<8x256xf32>
    %275 = arith.addf %273, %274 : vector<8x256xf32>
    %276 = vector.shape_cast %31 : vector<1x256xi1> to vector<1x256xi1>
    %277 = vector.broadcast %276 : vector<1x256xi1> to vector<8x256xi1>
    %278 = arith.select %277, %271, %275 : vector<8x256xi1>, vector<8x256xf32>
    %279 = vector.extract_strided_slice %278 {offsets = [0, 0], sizes = [8, 64], strides = [1, 1]} : vector<8x256xf32> to vector<8x64xf32>
    %280 = vector.extract_strided_slice %278 {offsets = [0, 64], sizes = [8, 64], strides = [1, 1]} : vector<8x256xf32> to vector<8x64xf32>
    %281 = vector.extract_strided_slice %278 {offsets = [0, 128], sizes = [8, 64], strides = [1, 1]} : vector<8x256xf32> to vector<8x64xf32>
    %282 = vector.extract_strided_slice %278 {offsets = [0, 192], sizes = [8, 64], strides = [1, 1]} : vector<8x256xf32> to vector<8x64xf32>
    %283 = arith.mulf %280, %258 : vector<8x64xf32>
    %284 = arith.mulf %279, %281 : vector<8x64xf32>
    %285 = arith.addf %283, %284 : vector<8x64xf32>
    %286 = math.tanh %285 : vector<8x64xf32>
    %287 = arith.mulf %282, %286 : vector<8x64xf32>
    %c6_i32_49 = arith.constant 6 : i32
    %c1_i32_50 = arith.constant 1 : i32
    %288 = vector.broadcast %c6_i32_49 : i32 to vector<1x64xi32>
    %289 = vector.broadcast %c1_i32_50 : i32 to vector<1x64xi32>
    %290 = arith.select %34, %288, %289 : vector<1x64xi1>, vector<1x64xi32>
    %291 = vector.broadcast %290 : vector<1x64xi32> to vector<8x64xi32>
    %292 = vector.broadcast %7 : vector<8x1xi32> to vector<8x64xi32>
    %293 = arith.cmpi slt, %291, %292 : vector<8x64xi32>
    %294 = arith.select %293, %287, %257 : vector<8x64xi1>, vector<8x64xf32>
    %295 = arith.select %293, %285, %258 : vector<8x64xi1>, vector<8x64xf32>
    %296 = vector.extract_strided_slice %5 {offsets = [56, 0], sizes = [8, 256], strides = [1, 1]} : vector<64x256xf32> to vector<8x256xf32>
    %297 = vector.extract_strided_slice %5 {offsets = [0, 0], sizes = [8, 256], strides = [1, 1]} : vector<64x256xf32> to vector<8x256xf32>
    %298 = vector.shape_cast %26 : vector<1x256xi1> to vector<1x256xi1>
    %299 = vector.broadcast %298 : vector<1x256xi1> to vector<8x256xi1>
    %300 = arith.select %299, %296, %297 : vector<8x256xi1>, vector<8x256xf32>
    %cst_51 = arith.constant dense<0.000000e+00> : vector<8x256xf32>
    %301 = tpu.matmul %294, %6, %cst_51 {dimension_numbers = #tpu.dot_dimension_numbers<[1], [0], [0], [1], [0, 0, 1, 1], [], []>} : vector<8x64xf32>, vector<64x256xf32>, vector<8x256xf32> -> vector<8x256xf32>
    %302 = arith.addf %300, %301 : vector<8x256xf32>
    %cst_52 = arith.constant 5.000000e-01 : f32
    %303 = vector.broadcast %cst_52 : f32 to vector<8x256xf32>
    %304 = arith.mulf %303, %302 : vector<8x256xf32>
    %305 = vector.shape_cast %31 : vector<1x256xi1> to vector<1x256xi1>
    %306 = vector.broadcast %305 : vector<1x256xi1> to vector<8x256xi1>
    %307 = arith.select %306, %302, %304 : vector<8x256xi1>, vector<8x256xf32>
    %308 = math.tanh %307 : vector<8x256xf32>
    %cst_53 = arith.constant 5.000000e-01 : f32
    %309 = vector.broadcast %cst_53 : f32 to vector<8x256xf32>
    %310 = arith.mulf %309, %308 : vector<8x256xf32>
    %cst_54 = arith.constant 5.000000e-01 : f32
    %311 = vector.broadcast %cst_54 : f32 to vector<8x256xf32>
    %312 = arith.addf %310, %311 : vector<8x256xf32>
    %313 = vector.shape_cast %31 : vector<1x256xi1> to vector<1x256xi1>
    %314 = vector.broadcast %313 : vector<1x256xi1> to vector<8x256xi1>
    %315 = arith.select %314, %308, %312 : vector<8x256xi1>, vector<8x256xf32>
    %316 = vector.extract_strided_slice %315 {offsets = [0, 0], sizes = [8, 64], strides = [1, 1]} : vector<8x256xf32> to vector<8x64xf32>
    %317 = vector.extract_strided_slice %315 {offsets = [0, 64], sizes = [8, 64], strides = [1, 1]} : vector<8x256xf32> to vector<8x64xf32>
    %318 = vector.extract_strided_slice %315 {offsets = [0, 128], sizes = [8, 64], strides = [1, 1]} : vector<8x256xf32> to vector<8x64xf32>
    %319 = vector.extract_strided_slice %315 {offsets = [0, 192], sizes = [8, 64], strides = [1, 1]} : vector<8x256xf32> to vector<8x64xf32>
    %320 = arith.mulf %317, %295 : vector<8x64xf32>
    %321 = arith.mulf %316, %318 : vector<8x64xf32>
    %322 = arith.addf %320, %321 : vector<8x64xf32>
    %323 = math.tanh %322 : vector<8x64xf32>
    %324 = arith.mulf %319, %323 : vector<8x64xf32>
    %c7_i32_55 = arith.constant 7 : i32
    %c0_i32_56 = arith.constant 0 : i32
    %325 = vector.broadcast %c7_i32_55 : i32 to vector<1x64xi32>
    %326 = vector.broadcast %c0_i32_56 : i32 to vector<1x64xi32>
    %327 = arith.select %34, %325, %326 : vector<1x64xi1>, vector<1x64xi32>
    %328 = vector.broadcast %327 : vector<1x64xi32> to vector<8x64xi32>
    %329 = vector.broadcast %7 : vector<8x1xi32> to vector<8x64xi32>
    %330 = arith.cmpi slt, %328, %329 : vector<8x64xi32>
    %331 = arith.select %330, %324, %294 : vector<8x64xi1>, vector<8x64xf32>
    %c0_57 = arith.constant 0 : index
    %c0_58 = arith.constant 0 : index
    %332 = vector.load %arg2[%c0_57, %c0_58] : memref<8x1xf32, #tpu.memory_space<vmem>>, vector<8x1xf32>
    %cst_59 = arith.constant 1.000000e+00 : f32
    %333 = vector.shape_cast %34 : vector<1x64xi1> to vector<1x64xi1>
    %334 = vector.broadcast %333 : vector<1x64xi1> to vector<8x64xi1>
    %335 = vector.shape_cast %332 : vector<8x1xf32> to vector<8x1xf32>
    %336 = vector.broadcast %335 : vector<8x1xf32> to vector<8x64xf32>
    %337 = vector.broadcast %cst_59 : f32 to vector<8x64xf32>
    %338 = arith.select %334, %336, %337 : vector<8x64xi1>, vector<8x64xf32>
    %339 = arith.mulf %331, %338 : vector<8x64xf32>
    %c0_60 = arith.constant 0 : index
    %c0_61 = arith.constant 0 : index
    %340 = vector.load %arg6[%c0_60, %c0_61] : memref<64x1xf32, #tpu.memory_space<vmem>>, vector<64x1xf32>
    %cst_62 = arith.constant dense<0.000000e+00> : vector<8x1xf32>
    %341 = tpu.matmul %339, %340, %cst_62 {dimension_numbers = #tpu.dot_dimension_numbers<[1], [0], [0], [1], [0, 0, 1, 1], [], []>} : vector<8x64xf32>, vector<64x1xf32>, vector<8x1xf32> -> vector<8x1xf32>
    %c0_63 = arith.constant 0 : index
    %c0_64 = arith.constant 0 : index
    %342 = vector.load %arg7[%c0_63, %c0_64] : memref<1x1xf32, #tpu.memory_space<vmem>>, vector<1x1xf32>
    %343 = vector.broadcast %342 : vector<1x1xf32> to vector<8x1xf32>
    %344 = arith.addf %341, %343 : vector<8x1xf32>
    %c0_65 = arith.constant 0 : index
    %c0_66 = arith.constant 0 : index
    %345 = vector.load %arg8[%c0_65, %c0_66] : memref<8x1xf32, #tpu.memory_space<vmem>>, vector<8x1xf32>
    tpu.vector_store %arg8[%c0_65, %c0_66], %344 {strides = array<i32>} : memref<8x1xf32, #tpu.memory_space<vmem>>, vector<8x1xf32>,
    return
  }
}

</mosaic_0001>

<bundles_post_ra>
// kernel: simple_lstm_forward.1
= control target key start
LH: loop header
LB: loop body
LE: loop exit
PB: predicated region body
PF: predicated region fallthrough
CT: control target
= control target key end

     0   :  { %v1524_v3 = vmov 0.0   ;;  %vm55_vm0 = vcmask 130048   ;;  %v45_v39 = vlaneseq  ;;  %vm252_vm6 = vcmask 523264   ;;  %s2098_s3 = inlined_call_operand.vmem [shape: f32[16,256], index: 3, kind: input, shape index: {}]   ;;  %s2099_s4 = inlined_call_operand.vmem [shape: f32[64,256], index: 4, kind: input, shape index: {}]   ;;  %s2100_s0 = inlined_call_operand.vmem [shape: f32[64,16], index: 0, kind: input, shape index: {}]   ;;  %s2101_s5 = inlined_call_operand.vmem [shape: f32[1,256], index: 5, kind: input, shape index: {}]   ;;  %s2102_s1 = inlined_call_operand.vmem [shape: s32[8,1], index: 1, kind: input, shape index: {}]   ;;  %s2103_s2 = inlined_call_operand.vmem [shape: f32[8,1], index: 2, kind: input, shape index: {}]   ;;  %s2104_s6 = inlined_call_operand.vmem [shape: f32[64,1], index: 6, kind: input, shape index: {}]   ;;  %s2105_s7 = inlined_call_operand.<no memory space> [shape: f32[1,1], index: 7, kind: input, shape index: {}]   ;;  %s2106_s8 = inlined_call_operand.vmem [shape: f32[8,1], index: 8, kind: output, shape index: {}]  }
   0x1   :  { %v40_v0 = vld [vmem:[%s2098_s3 + $0x8] sm:$0xff]  ;;  %v42_v1 = vld [vmem:[%s2098_s3 + $0x18] sm:$0xff]  ;;  %v39_v2 = vld [vmem:[%s2098_s3] sm:$0xff]  ;;  %144 = vmatprep.mubr.f32.mxu0 %v1524_v3  ;;  %320 = vmatprep.mubr.f32.mxu1 %v1524_v3  ;;  %vm1535_vm13 = vmmov 0   ;;  %vm1267_vm15 = vcmask 7168  }
   0x2   :  { %v1318_v4 = vpack.c.bf16 %v42_v1, %v40_v0  ;;  %v41_v5 = vld [vmem:[%s2098_s3 + $0x10] sm:$0xff]  ;;  %v194_v7 = vld [vmem:[%s2099_s4 + $0x8] sm:$0xff]  ;;  %v196_v8 = vld [vmem:[%s2099_s4 + $0x18] sm:$0xff]  ;;  %v46_v40 = vshrl.u32 %v45_v39, 7  ;;  %v1732_v51 = vand.u32 127, %v45_v39 }
   0x3   :  { %v1320_v6 = vpack.c.bf16 %v41_v5, %v39_v2  ;;  %v193_v9 = vld [vmem:[%s2099_s4] sm:$0xff]  ;;  %v195_v10 = vld [vmem:[%s2099_s4 + $0x10] sm:$0xff]  ;;  %v1610_v12 = vpack.c.bf16 %v196_v8, %v194_v7  ;;  %v198_v14 = vld [vmem:[%s2099_s4 + $0x28] sm:$0xff] }
   0x4   :  { %1319 = vmatprep.subr.bf16.mxu0 %v1318_v4  ;;  %v31_v11 = vld [vmem:[%s2100_s0] sm:$0xff]  ;;  %v1612_v13 = vpack.c.bf16 %v195_v10, %v193_v9  ;;  %v200_v15 = vld [vmem:[%s2099_s4 + $0x38] sm:$0xff]  ;;  %v199_v18 = vld [vmem:[%s2099_s4 + $0x30] sm:$0xff]  ;;  %v47_v41 = vsub.s32 0, %v46_v40  ;;  %v51_v44 = vsub.s32 1, %v46_v40  ;;  %v1739_v56 = vadd.s32 128, %v1732_v51 }
   0x5   :  { %1321 = vmatpush1.bf16.msra.mxu0 %v1320_v6  ;;  %v1620_v16 = vpack.c.bf16 %v200_v15, %v198_v14  ;;  %v197_v17 = vld [vmem:[%s2099_s4 + $0x20] sm:$0xff]  ;;  %1323 = vmatprep.subr.bf16.mxu1 %v1610_v12  ;;  %v202_v19 = vld [vmem:[%s2099_s4 + $0x48] sm:$0xff]  ;;  %v204_v20 = vld [vmem:[%s2099_s4 + $0x58] sm:$0xff]  ;;  %v217_v59 = vand.u32 63, %v1732_v51  ;;  %vm245_vm4 = vcmp.lt.s32.totalorder %v1732_v51, 32 }
   0x6   :  { %1355 = vmatprep.subr.bf16.mxu0 %v1610_v12  ;;  %1325 = vmatpush1.bf16.msra.mxu1 %v1612_v13  ;;  %v1638_v21 = vpack.c.bf16 %v199_v18, %v197_v17  ;;  %v32_v22 = vld [vmem:[%s2100_s0 + $0x8] sm:$0xff]  ;;  %v1645_v23 = vpack.c.bf16 %v204_v20, %v202_v19  ;;  %v201_v24 = vld [vmem:[%s2099_s4 + $0x40] sm:$0xff]  ;;  %v203_v25 = vld [vmem:[%s2099_s4 + $0x50] sm:$0xff]  ;;  %v224_v62 = vand.u32 63, %v1739_v56  ;;  %vm242_vm3 = vcmp.lt.s32.totalorder %v1739_v56, 192 }
   0x7   :  { %1327 = vmatprep.subr.bf16.mxu1 %v1620_v16  ;;  %v206_v26 = vld [vmem:[%s2099_s4 + $0x68] sm:$0xff]  ;;  %v208_v27 = vld [vmem:[%s2099_s4 + $0x78] sm:$0xff]  ;;  %v1663_v28 = vpack.c.bf16 %v203_v25, %v201_v24  ;;  %v33_v29 = vld [vmem:[%s2100_s0 + $0x10] sm:$0xff]  ;;  %vm1749_vm1 = vcmp.lt.s32.totalorder %v217_v59, 32 }
   0x8   :  { %1273 = vmatmul.mubr.msk.f32.vlgmr.msra.gmra.mrb[0].mxu0 %vm55_vm0, %v31_v11  ;;  %v1670_v30 = vpack.c.bf16 %v208_v27, %v206_v26  ;;  %v205_v31 = vld [vmem:[%s2099_s4 + $0x60] sm:$0xff]  ;;  %v207_v32 = vld [vmem:[%s2099_s4 + $0x70] sm:$0xff]  ;;  %v34_v34 = vld [vmem:[%s2100_s0 + $0x18] sm:$0xff]  ;;  %vm1755_vm2 = vcmp.lt.s32.totalorder %v224_v62, 32 }
   0x9   :  { %150 = vmatprep.mubr.f32.mxu0 %v1524_v3  ;;  %1357 = vmatpush1.bf16.msra.mxu0 %v1612_v13  ;;  %v1682_v33 = vpack.c.bf16 %v207_v32, %v205_v31  ;;  %v35_v35 = vld [vmem:[%s2100_s0 + $0x20] sm:$0xff]  ;;  %v36_v36 = vld [vmem:[%s2100_s0 + $0x28] sm:$0xff]  ;;  %v37_v37 = vld [vmem:[%s2100_s0 + $0x30] sm:$0xff] }
   0xa   :  { %1359 = vmatprep.subr.bf16.mxu0 %v1620_v16  ;;  %1329 = vmatpush1.bf16.msra.mxu1 %v1638_v21  ;;  %v38_v38 = vld [vmem:[%s2100_s0 + $0x38] sm:$0xff]  ;;  %v43_v42 = vld [vmem:[%s2101_s5] sm:$0x3]  ;;  %s1526_s0 = smov 64  }
   0xb   :  { %1331 = vmatprep.subr.bf16.mxu1 %v1645_v23  ;;  %v48_v46 = vrot.slane %v43_v42, %v47_v41  ;;  %v52_v47 = vrot.slane %v43_v42, %v51_v44  ;;  %v1169_v2 = vld [vmem:[%s2103_s2] sm:$0xff]  ;;  %v1182_v56 = vld [vmem:[%s2104_s6 + $0x18] sm:$0xff] }
   0xc   :  { %1274 = vmatmul.mubr.msk.f32.gmra.mrb[2].mxu0 %vm55_vm0, %v32_v22 }
   0xd   :  { %156 = vmatprep.mubr.f32.mxu0 %v1524_v3  ;;  %1361 = vmatpush1.bf16.msra.mxu0 %v1638_v21 }
   0xe   :  { %1363 = vmatprep.subr.bf16.mxu0 %v1645_v23  ;;  %1333 = vmatpush1.bf16.msra.mxu1 %v1663_v28 }
   0xf   :  { %1335 = vmatprep.subr.bf16.mxu1 %v1670_v30 }
  0x10   :  { %1275 = vmatmul.mubr.msk.f32.gmra.mrb[4].mxu0 %vm55_vm0, %v33_v29 }
  0x11   :  { %162 = vmatprep.mubr.f32.mxu0 %v1524_v3  ;;  %1365 = vmatpush1.bf16.msra.mxu0 %v1663_v28 }
  0x12   :  { %1367 = vmatprep.subr.bf16.mxu0 %v1670_v30  ;;  %1337 = vmatpush1.bf16.msra.mxu1 %v1682_v33 }
  0x13   :  { %1339 = vmatprep.subr.bf16.mxu1 %v1610_v12 }
  0x14   :  { %1276 = vmatmul.mubr.msk.f32.gmra.mrb[6].mxu0 %vm55_vm0, %v34_v34 }
  0x15   :  { %168 = vmatprep.mubr.f32.mxu0 %v1524_v3  ;;  %1369 = vmatpush1.bf16.msra.mxu0 %v1682_v33 }
  0x16   :  { %321 = vmatmul.mubr.f32.vlgmr.msra.gmra.mrb[0].mxu1 %v1524_v3  ;;  %1387 = vmatprep.subr.bf16.mxu0 %v1610_v12 }
  0x17   :  { %1341 = vmatpush1.bf16.msra.mxu1 %v1612_v13  ;;  %438 = vmatprep.mubr.f32.mxu1 %v1524_v3 }
  0x18   :  { %1277 = vmatmul.mubr.msk.f32.gmra.mrb[8].mxu0 %vm55_vm0, %v35_v35  ;;  %1343 = vmatprep.subr.bf16.mxu1 %v1620_v16 }
  0x19   :  { %174 = vmatprep.mubr.f32.mxu0 %v1524_v3 }
  0x1b   :  { %1345 = vmatpush1.bf16.msra.mxu1 %v1638_v21 }
  0x1c   :  { %1278 = vmatmul.mubr.msk.f32.gmra.mrb[10].mxu0 %vm55_vm0, %v36_v36  ;;  %1347 = vmatprep.subr.bf16.mxu1 %v1645_v23 }
  0x1d   :  { %180 = vmatprep.mubr.f32.mxu0 %v1524_v3 }
  0x1f   :  { %1349 = vmatpush1.bf16.msra.mxu1 %v1663_v28 }
  0x20   :  { %1279 = vmatmul.mubr.msk.f32.gmra.mrb[12].mxu0 %vm55_vm0, %v37_v37  ;;  %1351 = vmatprep.subr.bf16.mxu1 %v1670_v30 }
  0x21   :  { %186 = vmatprep.mubr.f32.mxu0 %v1524_v3 }
  0x23   :  { %1353 = vmatpush1.bf16.msra.mxu1 %v1682_v33 }
  0x24   :  { %1280 = vmatmul.mubr.msk.f32.gmra.mrb[14].mxu0 %vm55_vm0, %v38_v38  ;;  %1371 = vmatprep.subr.bf16.mxu1 %v1610_v12 }
  0x25   :  { %553 = vmatprep.mubr.f32.mxu0 %v1524_v3 }
  0xdb   :  { %v146_v43 = vpop.f32.mrb[0].mxu0 }
  0xdc   :  { %v148_v45 = vpop.f32.mrb[1].mxu0  ;;  %v1817_v38 = vadd.f32 %v146_v43, %v48_v46 }
  0xdd   :  { %v1821_v41 = vadd.f32 %v148_v45, %v52_v47 }
  0xdf   :  { %v152_v48 = vpop.f32.mrb[2].mxu0 }
  0xe0   :  { %v1730_v49 = vadd.f32 %v152_v48, %v48_v46  ;;  %v154_v50 = vpop.f32.mrb[3].mxu0 }
  0xe1   :  { %v1734_v52 = vadd.f32 %v154_v50, %v52_v47 }
  0xe3   :  { %v158_v53 = vpop.f32.mrb[4].mxu0 }
  0xe4   :  { %v1736_v54 = vadd.f32 %v158_v53, %v48_v46  ;;  %v160_v55 = vpop.f32.mrb[5].mxu0 }
  0xe5   :  { %v1741_v57 = vadd.f32 %v160_v55, %v52_v47 }
  0xe7   :  { %v164_v58 = vpop.f32.mrb[6].mxu0 }
  0xe8   :  { %v1744_v60 = vadd.f32 %v164_v58, %v48_v46  ;;  %v166_v61 = vpop.f32.mrb[7].mxu0  ;;  %v1525_v58 = vmov 0  }
  0xe9   :  { %v1747_v63 = vadd.f32 %v166_v61, %v52_v47  ;;  %v322_v0 = vpop.f32.mrb[0].mxu1  ;;  %1474 = vset.pattern.permute.xlu0 %v1525_v58  ;;  %1475 = vset.pattern.permute.xlu1 %v1525_v58 }
  0xea   :  { %v324_v4 = vpop.f32.mrb[1].mxu1 }
  0xeb   :  { %v170_v1 = vpop.f32.mrb[8].mxu0 }
  0xec   :  { %v1753_v5 = vadd.f32 %v170_v1, %v48_v46  ;;  %v172_v6 = vpop.f32.mrb[9].mxu0 }
  0xed   :  { %v1759_v8 = vadd.f32 %v172_v6, %v52_v47 }
  0xee   :  { %v599_v9 = vsel %vm1749_vm1, %v1744_v60, %v1753_v5  ;;  %v714_v10 = vsel %vm1749_vm1, %v1753_v5, %v1744_v60 }
  0xef   :  { %v176_v11 = vpop.f32.mrb[10].mxu0  ;;  %v600_v14 = vsel %vm1755_vm2, %v1747_v63, %v1759_v8  ;;  %v715_v15 = vsel %vm1755_vm2, %v1759_v8, %v1747_v63 }
  0xf0   :  { %v1777_v17 = vadd.f32 %v176_v11, %v48_v46  ;;  %v178_v18 = vpop.f32.mrb[11].mxu0 }
  0xf1   :  { %v1779_v19 = vadd.f32 %v178_v18, %v52_v47  ;;  %v209_v18 = vld [vmem:[%s2102_s1] sm:$0xff] }
  0xf2   :  { %v484_v20 = vsel %vm1749_vm1, %v1736_v54, %v1777_v17  ;;  %v829_v22 = vsel %vm1749_vm1, %v1777_v17, %v1736_v54 }
  0xf3   :  { %v182_v24 = vpop.f32.mrb[12].mxu0  ;;  %v485_v25 = vsel %vm1755_vm2, %v1741_v57, %v1779_v19  ;;  %v830_v26 = vsel %vm1755_vm2, %v1779_v19, %v1741_v57 }
  0xf4   :  { %v1797_v27 = vadd.f32 %v182_v24, %v48_v46  ;;  %v184_v29 = vpop.f32.mrb[13].mxu0 }
  0xf5   :  { %v1799_v31 = vadd.f32 %v184_v29, %v52_v47 }
  0xf6   :  { %v369_v32 = vsel %vm1749_vm1, %v1730_v49, %v1797_v27  ;;  %v944_v34 = vsel %vm1749_vm1, %v1797_v27, %v1730_v49 }
  0xf7   :  { %v188_v35 = vpop.f32.mrb[14].mxu0  ;;  %v370_v36 = vsel %vm1755_vm2, %v1734_v52, %v1799_v31  ;;  %v945_v37 = vsel %vm1755_vm2, %v1799_v31, %v1734_v52 }
  0xf8   :  { %v1819_v39 = vadd.f32 %v188_v35, %v48_v46  ;;  %v190_v40 = vpop.f32.mrb[15].mxu0 }
  0xf9   :  { %v1823_v42 = vadd.f32 %v190_v40, %v52_v47 }
  0xfa   :  { %v250_v44 = vsel %vm1749_vm1, %v1817_v38, %v1819_v39  ;;  %v1059_v48 = vsel %vm1749_vm1, %v1819_v39, %v1817_v38 }
  0xfb   :  { %v327_v50 = vadd.f32 %v322_v0, %v250_v44  ;;  %v251_v43 = vsel %vm1755_vm2, %v1821_v41, %v1823_v42  ;;  %v1060_v45 = vsel %vm1755_vm2, %v1823_v42, %v1821_v41 }
  0xfc   :  { %v328_v46 = vadd.f32 %v324_v4, %v251_v43  ;;  %v1527_v43 = vmov 7  }
  0xfd   :  { %v329_v47 = vmul.f32 0.5, %v327_v50 }
  0xfe   :  { %v330_v53 = vmul.f32 0.5, %v328_v46 }
  0xff   :  { %1476 = vtanh.f32 %v329_v47 }
 0x100   :  { %v336_v55 = vsel %vm242_vm3, %v328_v46, %v330_v53  ;;  %v354_v46 = vsel %vm245_vm4, 0, %v1527_v43 }
 0x101   :  { %1478 = vtanh.f32 %v336_v55 }
 0x109   :  { %v1477_v59 = vpop.eup %1476 }
 0x10a   :  { %v339_v62 = vmul.f32 0.5, %v1477_v59 }
 0x10b   :  { %v1479_v61 = vpop.eup %1478 }
 0x10c   :  { %v340_v0 = vmul.f32 0.5, %v1479_v61  ;;  %v341_v4 = vadd.f32 0.5, %v339_v62 }
 0x10e   :  { %v342_v1 = vadd.f32 0.5, %v340_v0  ;;  %v345_v24 = vmul.f32 0.0, %v341_v4 }
 0x110   :  { %v344_v6 = vsel %vm242_vm3, %v1479_v61, %v342_v1 }
 0x111   :  { %v346_v11 = vmul.f32 %v344_v6, %v341_v4 }
 0x113   :  { %348 = vrot.lane.b32.xlu0 %v346_v11, %s1526_s0 }
 0x117   :  { %356 = vperm.xlu0 %1474, %v209_v18  }
 0x185   :  { %v349_v29 = vpop.permute.xlu0 %348 }
 0x186   :  { %v351_v35 = vadd.f32 %v349_v29, %v345_v24 }
 0x188   :  { %1480 = vtanh.f32 %v351_v35 }
 0x192   :  { %v1481_v40 = vpop.eup %1480 }
 0x193   :  { %v353_v44 = vmul.f32 %v1481_v40, %v344_v6 }
 0x195   :  { %360 = vrot.lane.b32.xlu1 %v353_v44, %s1526_s0 }
 0x196   :  { %v1855_v50 = vpop.permute.xlu0 %356 }
 0x197   :  { %vm358_vm5 = vcmp.lt.s32.totalorder %v354_v46, %v1855_v50 }
 0x199   :  { %365 = vrot.lane.b32.xlu1 %v351_v35, %s1526_s0 }
 0x207   :  { %v361_v47 = vpop.permute.xlu1 %360 }
 0x208   :  { %v363_v53 = vsel %vm358_vm5, %v361_v47, 0.0 }
 0x209   :  { %1281 = vmatmul.mubr.msk.f32.vlgmr.msra.gmra.mrb[2].mxu1 %vm252_vm6, %v363_v53 }
 0x20a   :  { %1373 = vmatpush1.bf16.msra.mxu1 %v1612_v13  ;;  %668 = vmatprep.mubr.f32.mxu1 %v1524_v3 }
 0x20b   :  { %v366_v55 = vpop.permute.xlu1 %365  ;;  %1375 = vmatprep.subr.bf16.mxu1 %v1620_v16 }
 0x20c   :  { %v368_v59 = vsel %vm358_vm5, %v366_v55, 0.0 }
 0x20d   :  { %460 = vrot.lane.b32.xlu1 %v368_v59, %s1526_s0 }
 0x20e   :  { %1377 = vmatpush1.bf16.msra.mxu1 %v1638_v21 }
 0x20f   :  { %1379 = vmatprep.subr.bf16.mxu1 %v1645_v23 }
 0x212   :  { %1381 = vmatpush1.bf16.msra.mxu1 %v1663_v28 }
 0x213   :  { %1383 = vmatprep.subr.bf16.mxu1 %v1670_v30 }
 0x216   :  { %1385 = vmatpush1.bf16.msra.mxu1 %v1682_v33 }
 0x217   :  { %1403 = vmatprep.subr.bf16.mxu1 %v1610_v12 }
 0x2dc   :  { %v440_v61 = vpop.f32.mrb[2].mxu1 }
 0x2dd   :  { %v445_v62 = vadd.f32 %v440_v61, %v369_v32  ;;  %v442_v0 = vpop.f32.mrb[3].mxu1 }
 0x2de   :  { %v446_v1 = vadd.f32 %v442_v0, %v370_v36  ;;  %v461_v36 = vpop.permute.xlu1 %460  ;;  %v1528_v0 = vmov 6  }
 0x2df   :  { %v447_v4 = vmul.f32 0.5, %v445_v62 }
 0x2e0   :  { %v448_v6 = vmul.f32 0.5, %v446_v1 }
 0x2e1   :  { %1482 = vtanh.f32 %v447_v4 }
 0x2e2   :  { %v450_v11 = vsel %vm242_vm3, %v446_v1, %v448_v6  ;;  %v472_v1 = vsel %vm245_vm4, 1, %v1528_v0 }
 0x2e3   :  { %1484 = vtanh.f32 %v450_v11  ;;  %vm473_vm7 = vcmp.lt.s32.totalorder %v472_v1, %v1855_v50 }
 0x2eb   :  { %v1483_v18 = vpop.eup %1482 }
 0x2ec   :  { %v453_v29 = vmul.f32 0.5, %v1483_v18 }
 0x2ed   :  { %v1485_v24 = vpop.eup %1484 }
 0x2ee   :  { %v454_v35 = vmul.f32 0.5, %v1485_v24  ;;  %v455_v32 = vadd.f32 0.5, %v453_v29 }
 0x2f0   :  { %v456_v40 = vadd.f32 0.5, %v454_v35  ;;  %v463_v46 = vmul.f32 %v461_v36, %v455_v32 }
 0x2f2   :  { %v458_v44 = vsel %vm242_vm3, %v1485_v24, %v456_v40 }
 0x2f3   :  { %v464_v43 = vmul.f32 %v458_v44, %v455_v32 }
 0x2f5   :  { %466 = vrot.lane.b32.xlu0 %v464_v43, %s1526_s0 }
 0x367   :  { %v467_v47 = vpop.permute.xlu0 %466 }
 0x368   :  { %v469_v55 = vadd.f32 %v467_v47, %v463_v46 }
 0x36a   :  { %1486 = vtanh.f32 %v469_v55  ;;  %480 = vrot.lane.b32.xlu0 %v469_v55, %s1526_s0 }
 0x374   :  { %v1487_v61 = vpop.eup %1486 }
 0x375   :  { %v471_v62 = vmul.f32 %v1487_v61, %v458_v44 }
 0x377   :  { %475 = vrot.lane.b32.xlu1 %v471_v62, %s1526_s0 }
 0x3dc   :  { %v481_v4 = vpop.permute.xlu0 %480 }
 0x3dd   :  { %v483_v6 = vsel %vm473_vm7, %v481_v4, %v368_v59 }
 0x3de   :  { %575 = vrot.lane.b32.xlu1 %v483_v6, %s1526_s0 }
 0x3e9   :  { %v476_v11 = vpop.permute.xlu1 %475 }
 0x3ea   :  { %v478_v18 = vsel %vm473_vm7, %v476_v11, %v363_v53 }
 0x3eb   :  { %1282 = vmatmul.mubr.msk.f32.vlgmr.msra.gmra.mrb[16].mxu0 %vm252_vm6, %v478_v18 }
 0x3ec   :  { %1389 = vmatpush1.bf16.msra.mxu0 %v1612_v13  ;;  %783 = vmatprep.mubr.f32.mxu0 %v1524_v3 }
 0x3ed   :  { %1391 = vmatprep.subr.bf16.mxu0 %v1620_v16 }
 0x3f0   :  { %1393 = vmatpush1.bf16.msra.mxu0 %v1638_v21 }
 0x3f1   :  { %1395 = vmatprep.subr.bf16.mxu0 %v1645_v23 }
 0x3f4   :  { %1397 = vmatpush1.bf16.msra.mxu0 %v1663_v28 }
 0x3f5   :  { %1399 = vmatprep.subr.bf16.mxu0 %v1670_v30 }
 0x3f8   :  { %1401 = vmatpush1.bf16.msra.mxu0 %v1682_v33 }
 0x3f9   :  { %1419 = vmatprep.subr.bf16.mxu0 %v1610_v12 }
 0x4be   :  { %v555_v53 = vpop.f32.mrb[16].mxu0 }
 0x4bf   :  { %v560_v59 = vadd.f32 %v555_v53, %v484_v20  ;;  %v557_v24 = vpop.f32.mrb[17].mxu0  ;;  %v1529_v53 = vmov 5  }
 0x4c0   :  { %v561_v29 = vadd.f32 %v557_v24, %v485_v25  ;;  %v576_v25 = vpop.permute.xlu1 %575 }
 0x4c1   :  { %v562_v35 = vmul.f32 0.5, %v560_v59  ;;  %v587_v59 = vsel %vm245_vm4, 2, %v1529_v53 }
 0x4c2   :  { %v563_v40 = vmul.f32 0.5, %v561_v29  ;;  %vm588_vm8 = vcmp.lt.s32.totalorder %v587_v59, %v1855_v50  ;;  %v1530_v59 = vmov 4  }
 0x4c3   :  { %1488 = vtanh.f32 %v562_v35 }
 0x4c4   :  { %v565_v32 = vsel %vm242_vm3, %v561_v29, %v563_v40 }
 0x4c5   :  { %1490 = vtanh.f32 %v565_v32 }
 0x4cd   :  { %v1489_v44 = vpop.eup %1488 }
 0x4ce   :  { %v568_v36 = vmul.f32 0.5, %v1489_v44 }
 0x4cf   :  { %v1491_v43 = vpop.eup %1490 }
 0x4d0   :  { %v569_v46 = vmul.f32 0.5, %v1491_v43  ;;  %v570_v20 = vadd.f32 0.5, %v568_v36 }
 0x4d2   :  { %v571_v47 = vadd.f32 0.5, %v569_v46  ;;  %v578_v62 = vmul.f32 %v576_v25, %v570_v20 }
 0x4d4   :  { %v573_v55 = vsel %vm242_vm3, %v1491_v43, %v571_v47 }
 0x4d5   :  { %v579_v61 = vmul.f32 %v573_v55, %v570_v20 }
 0x4d7   :  { %581 = vrot.lane.b32.xlu0 %v579_v61, %s1526_s0 }
 0x549   :  { %v582_v0 = vpop.permute.xlu0 %581 }
 0x54a   :  { %v584_v1 = vadd.f32 %v582_v0, %v578_v62 }
 0x54c   :  { %1492 = vtanh.f32 %v584_v1  ;;  %595 = vrot.lane.b32.xlu0 %v584_v1, %s1526_s0 }
 0x556   :  { %v1493_v4 = vpop.eup %1492 }
 0x557   :  { %v586_v11 = vmul.f32 %v1493_v4, %v573_v55 }
 0x559   :  { %590 = vrot.lane.b32.xlu1 %v586_v11, %s1526_s0 }
 0x5be   :  { %v596_v24 = vpop.permute.xlu0 %595 }
 0x5bf   :  { %v598_v29 = vsel %vm588_vm8, %v596_v24, %v483_v6  ;;  %v702_v24 = vsel %vm245_vm4, 3, %v1530_v59 }
 0x5c0   :  { %690 = vrot.lane.b32.xlu1 %v598_v29, %s1526_s0  ;;  %vm703_vm9 = vcmp.lt.s32.totalorder %v702_v24, %v1855_v50 }
 0x5cb   :  { %v591_v35 = vpop.permute.xlu1 %590 }
 0x5cc   :  { %v593_v40 = vsel %vm588_vm8, %v591_v35, %v478_v18 }
 0x5cd   :  { %1283 = vmatmul.mubr.msk.f32.vlgmr.msra.gmra.mrb[4].mxu1 %vm252_vm6, %v593_v40 }
 0x5ce   :  { %1405 = vmatpush1.bf16.msra.mxu1 %v1612_v13  ;;  %898 = vmatprep.mubr.f32.mxu1 %v1524_v3 }
 0x5cf   :  { %1407 = vmatprep.subr.bf16.mxu1 %v1620_v16 }
 0x5d2   :  { %1409 = vmatpush1.bf16.msra.mxu1 %v1638_v21 }
 0x5d3   :  { %1411 = vmatprep.subr.bf16.mxu1 %v1645_v23 }
 0x5d6   :  { %1413 = vmatpush1.bf16.msra.mxu1 %v1663_v28 }
 0x5d7   :  { %1415 = vmatprep.subr.bf16.mxu1 %v1670_v30 }
 0x5da   :  { %1417 = vmatpush1.bf16.msra.mxu1 %v1682_v33 }
 0x5db   :  { %1435 = vmatprep.subr.bf16.mxu1 %v1610_v12 }
 0x6a0   :  { %v670_v6 = vpop.f32.mrb[4].mxu1 }
 0x6a1   :  { %v675_v18 = vadd.f32 %v670_v6, %v599_v9  ;;  %v672_v32 = vpop.f32.mrb[5].mxu1 }
 0x6a2   :  { %v676_v44 = vadd.f32 %v672_v32, %v600_v14  ;;  %v691_v14 = vpop.permute.xlu1 %690 }
 0x6a3   :  { %v677_v43 = vmul.f32 0.5, %v675_v18 }
 0x6a4   :  { %v678_v36 = vmul.f32 0.5, %v676_v44 }
 0x6a5   :  { %1494 = vtanh.f32 %v677_v43 }
 0x6a6   :  { %v680_v12 = vsel %vm242_vm3, %v676_v44, %v678_v36 }
 0x6a7   :  { %1496 = vtanh.f32 %v680_v12 }
 0x6af   :  { %v1495_v46 = vpop.eup %1494 }
 0x6b0   :  { %v683_v20 = vmul.f32 0.5, %v1495_v46 }
 0x6b1   :  { %v1497_v47 = vpop.eup %1496 }
 0x6b2   :  { %v684_v55 = vmul.f32 0.5, %v1497_v47  ;;  %v685_v9 = vadd.f32 0.5, %v683_v20 }
 0x6b4   :  { %v686_v61 = vadd.f32 0.5, %v684_v55  ;;  %v693_v0 = vmul.f32 %v691_v14, %v685_v9 }
 0x6b6   :  { %v688_v25 = vsel %vm242_vm3, %v1497_v47, %v686_v61 }
 0x6b7   :  { %v694_v62 = vmul.f32 %v688_v25, %v685_v9 }
 0x6b9   :  { %696 = vrot.lane.b32.xlu0 %v694_v62, %s1526_s0 }
 0x72b   :  { %v697_v1 = vpop.permute.xlu0 %696 }
 0x72c   :  { %v699_v4 = vadd.f32 %v697_v1, %v693_v0  ;;  %v1531_v0 = vmov 3  }
 0x72d   :  { %v817_v1 = vsel %vm245_vm4, 4, %v1531_v0 }
 0x72e   :  { %1498 = vtanh.f32 %v699_v4  ;;  %710 = vrot.lane.b32.xlu0 %v699_v4, %s1526_s0  ;;  %vm818_vm10 = vcmp.lt.s32.totalorder %v817_v1, %v1855_v50 }
 0x738   :  { %v1499_v11 = vpop.eup %1498 }
 0x739   :  { %v701_v53 = vmul.f32 %v1499_v11, %v688_v25 }
 0x73b   :  { %705 = vrot.lane.b32.xlu1 %v701_v53, %s1526_s0 }
 0x7a0   :  { %v711_v35 = vpop.permute.xlu0 %710 }
 0x7a1   :  { %v713_v6 = vsel %vm703_vm9, %v711_v35, %v598_v29 }
 0x7a2   :  { %805 = vrot.lane.b32.xlu1 %v713_v6, %s1526_s0 }
 0x7ad   :  { %v706_v18 = vpop.permute.xlu1 %705 }
 0x7ae   :  { %v708_v32 = vsel %vm703_vm9, %v706_v18, %v593_v40 }
 0x7af   :  { %1284 = vmatmul.mubr.msk.f32.vlgmr.msra.gmra.mrb[18].mxu0 %vm252_vm6, %v708_v32 }
 0x7b0   :  { %1421 = vmatpush1.bf16.msra.mxu0 %v1612_v13  ;;  %1013 = vmatprep.mubr.f32.mxu0 %v1524_v3 }
 0x7b1   :  { %1423 = vmatprep.subr.bf16.mxu0 %v1620_v16 }
 0x7b4   :  { %1425 = vmatpush1.bf16.msra.mxu0 %v1638_v21 }
 0x7b5   :  { %1427 = vmatprep.subr.bf16.mxu0 %v1645_v23 }
 0x7b8   :  { %1429 = vmatpush1.bf16.msra.mxu0 %v1663_v28 }
 0x7b9   :  { %1431 = vmatprep.subr.bf16.mxu0 %v1670_v30 }
 0x7bc   :  { %1433 = vmatpush1.bf16.msra.mxu0 %v1682_v33 }
 0x814   :  { %v806_v63 = vpop.permute.xlu1 %805 }
 0x882   :  { %v785_v29 = vpop.f32.mrb[18].mxu0 }
 0x883   :  { %v790_v40 = vadd.f32 %v785_v29, %v714_v10  ;;  %v787_v44 = vpop.f32.mrb[19].mxu0 }
 0x884   :  { %v791_v43 = vadd.f32 %v787_v44, %v715_v15 }
 0x885   :  { %v792_v36 = vmul.f32 0.5, %v790_v40 }
 0x886   :  { %v793_v12 = vmul.f32 0.5, %v791_v43 }
 0x887   :  { %1500 = vtanh.f32 %v792_v36 }
 0x888   :  { %v795_v46 = vsel %vm242_vm3, %v791_v43, %v793_v12  ;;  %v1532_v43 = vmov 2  }
 0x889   :  { %1502 = vtanh.f32 %v795_v46  ;;  %v932_v36 = vsel %vm245_vm4, 5, %v1532_v43 }
 0x88a   :  { %vm933_vm11 = vcmp.lt.s32.totalorder %v932_v36, %v1855_v50 }
 0x891   :  { %v1501_v47 = vpop.eup %1500 }
 0x892   :  { %v798_v55 = vmul.f32 0.5, %v1501_v47 }
 0x893   :  { %v1503_v20 = vpop.eup %1502 }
 0x894   :  { %v799_v61 = vmul.f32 0.5, %v1503_v20  ;;  %v800_v5 = vadd.f32 0.5, %v798_v55 }
 0x896   :  { %v801_v60 = vadd.f32 0.5, %v799_v61  ;;  %v808_v8 = vmul.f32 %v806_v63, %v800_v5 }
 0x898   :  { %v803_v10 = vsel %vm242_vm3, %v1503_v20, %v801_v60 }
 0x899   :  { %v809_v9 = vmul.f32 %v803_v10, %v800_v5 }
 0x89b   :  { %811 = vrot.lane.b32.xlu0 %v809_v9, %s1526_s0 }
 0x90d   :  { %v812_v15 = vpop.permute.xlu0 %811 }
 0x90e   :  { %v814_v25 = vadd.f32 %v812_v15, %v808_v8 }
 0x910   :  { %1504 = vtanh.f32 %v814_v25  ;;  %825 = vrot.lane.b32.xlu0 %v814_v25, %s1526_s0 }
 0x91a   :  { %v1505_v62 = vpop.eup %1504 }
 0x91b   :  { %v816_v14 = vmul.f32 %v1505_v62, %v803_v10 }
 0x91d   :  { %820 = vrot.lane.b32.xlu1 %v816_v14, %s1526_s0 }
 0x982   :  { %v826_v4 = vpop.permute.xlu0 %825 }
 0x983   :  { %v828_v11 = vsel %vm818_vm10, %v826_v4, %v713_v6 }
 0x984   :  { %920 = vrot.lane.b32.xlu1 %v828_v11, %s1526_s0 }
 0x98f   :  { %v821_v53 = vpop.permute.xlu1 %820 }
 0x990   :  { %v823_v59 = vsel %vm818_vm10, %v821_v53, %v708_v32 }
 0x991   :  { %1285 = vmatmul.mubr.msk.f32.vlgmr.msra.gmra.mrb[6].mxu1 %vm252_vm6, %v823_v59 }
 0x992   :  { %1437 = vmatpush1.bf16.msra.mxu1 %v1612_v13  ;;  %1128 = vmatprep.mubr.f32.mxu1 %v1524_v3 }
 0x993   :  { %1439 = vmatprep.subr.bf16.mxu1 %v1620_v16 }
 0x996   :  { %1441 = vmatpush1.bf16.msra.mxu1 %v1638_v21 }
 0x997   :  { %1443 = vmatprep.subr.bf16.mxu1 %v1645_v23 }
 0x99a   :  { %1445 = vmatpush1.bf16.msra.mxu1 %v1663_v28 }
 0x99b   :  { %1447 = vmatprep.subr.bf16.mxu1 %v1670_v30 }
 0x99e   :  { %1449 = vmatpush1.bf16.msra.mxu1 %v1682_v33 }
 0x9f6   :  { %v921_v57 = vpop.permute.xlu1 %920 }
 0xa64   :  { %v900_v24 = vpop.f32.mrb[6].mxu1 }
 0xa65   :  { %v905_v13 = vadd.f32 %v900_v24, %v829_v22  ;;  %v902_v35 = vpop.f32.mrb[7].mxu1 }
 0xa66   :  { %v906_v16 = vadd.f32 %v902_v35, %v830_v26 }
 0xa67   :  { %v907_v21 = vmul.f32 0.5, %v905_v13 }
 0xa68   :  { %v908_v23 = vmul.f32 0.5, %v906_v16 }
 0xa69   :  { %1506 = vtanh.f32 %v907_v21 }
 0xa6a   :  { %v910_v28 = vsel %vm242_vm3, %v906_v16, %v908_v23 }
 0xa6b   :  { %1508 = vtanh.f32 %v910_v28 }
 0xa73   :  { %v1507_v30 = vpop.eup %1506 }
 0xa74   :  { %v913_v6 = vmul.f32 0.5, %v1507_v30 }
 0xa75   :  { %v1509_v33 = vpop.eup %1508 }
 0xa76   :  { %v914_v18 = vmul.f32 0.5, %v1509_v33  ;;  %v915_v17 = vadd.f32 0.5, %v913_v6 }
 0xa78   :  { %v916_v54 = vadd.f32 0.5, %v914_v18  ;;  %v923_v19 = vmul.f32 %v921_v57, %v915_v17 }
 0xa7a   :  { %v918_v22 = vsel %vm242_vm3, %v1509_v33, %v916_v54 }
 0xa7b   :  { %v924_v32 = vmul.f32 %v918_v22, %v915_v17  ;;  %v1179_v17 = vld [vmem:[%s2104_s6] sm:$0xff] }
 0xa7d   :  { %926 = vrot.lane.b32.xlu0 %v924_v32, %s1526_s0  ;;  %v1181_v32 = vld [vmem:[%s2104_s6 + $0x10] sm:$0xff] }
 0xaef   :  { %v927_v26 = vpop.permute.xlu0 %926 }
 0xaf0   :  { %v929_v29 = vadd.f32 %v927_v26, %v923_v19  ;;  %v1454_v19 = vpack.c.bf16 %v1182_v56, %v1181_v32  ;;  %v1183_v26 = vld [vmem:[%s2104_s6 + $0x20] sm:$0xff] }
 0xaf2   :  { %1510 = vtanh.f32 %v929_v29  ;;  %940 = vrot.lane.b32.xlu0 %v929_v29, %s1526_s0  ;;  %v1184_v29 = vld [vmem:[%s2104_s6 + $0x28] sm:$0xff] }
 0xafc   :  { %v1511_v40 = vpop.eup %1510 }
 0xafd   :  { %v931_v44 = vmul.f32 %v1511_v40, %v918_v22  ;;  %v1180_v22 = vld [vmem:[%s2104_s6 + $0x8] sm:$0xff]  ;;  %v1457_v40 = vpack.c.bf16 %v1184_v29, %v1183_v26 }
 0xafe   :  { %v1451_v57 = vpack.c.bf16 %v1180_v22, %v1179_v17 }
 0xaff   :  { %935 = vrot.lane.b32.xlu1 %v931_v44, %s1526_s0 }
 0xb64   :  { %v941_v12 = vpop.permute.xlu0 %940 }
 0xb65   :  { %v943_v46 = vsel %vm933_vm11, %v941_v12, %v828_v11  ;;  %v1533_v11 = vmov 1   ;;  %v1185_v12 = vld [vmem:[%s2104_s6 + $0x30] sm:$0xff] }
 0xb66   :  { %1035 = vrot.lane.b32.xlu1 %v943_v46, %s1526_s0  ;;  %v1047_v53 = vsel %vm245_vm4, 6, %v1533_v11 }
 0xb67   :  { %vm1048_vm12 = vcmp.lt.s32.totalorder %v1047_v53, %v1855_v50 }
 0xb71   :  { %v936_v47 = vpop.permute.xlu1 %935 }
 0xb72   :  { %v938_v20 = vsel %vm933_vm11, %v936_v47, %v823_v59 }
 0xb73   :  { %1286 = vmatmul.mubr.msk.f32.vlgmr.msra.gmra.mrb[20].mxu0 %vm252_vm6, %v938_v20 }
 0xb74   :  { %1315 = vmatprep.mubr.msk.f32.mxu0 %vm1535_vm13, %v1524_v3 }
 0xbd8   :  { %v1036_v52 = vpop.permute.xlu1 %1035 }
 0xc46   :  { %v1015_v55 = vpop.f32.mrb[20].mxu0 }
 0xc47   :  { %v1020_v61 = vadd.f32 %v1015_v55, %v944_v34  ;;  %v1017_v60 = vpop.f32.mrb[21].mxu0  ;;  %v13_v55 = vstv %s2105_s7 }
 0xc48   :  { %v1021_v5 = vadd.f32 %v1017_v60, %v945_v37  ;;  %14 = vst [vmem:[#allocation2] sm:$0x1] %v13_v55 }
 0xc49   :  { %v1022_v10 = vmul.f32 0.5, %v1020_v61 }
 0xc4a   :  { %v1023_v9 = vmul.f32 0.5, %v1021_v5 }
 0xc4b   :  { %1512 = vtanh.f32 %v1022_v10  ;;  %v1162_v10 = vsel %vm245_vm4, 7, %v1525_v58 }
 0xc4c   :  { %v1025_v63 = vsel %vm242_vm3, %v1021_v5, %v1023_v9  ;;  %vm1163_vm14 = vcmp.lt.s32.totalorder %v1162_v10, %v1855_v50 }
 0xc4d   :  { %1514 = vtanh.f32 %v1025_v63 }
 0xc55   :  { %v1513_v8 = vpop.eup %1512 }
 0xc56   :  { %v1028_v25 = vmul.f32 0.5, %v1513_v8 }
 0xc57   :  { %v1515_v15 = vpop.eup %1514 }
 0xc58   :  { %v1029_v62 = vmul.f32 0.5, %v1515_v15  ;;  %v1030_v27 = vadd.f32 0.5, %v1028_v25 }
 0xc5a   :  { %v1031_v49 = vadd.f32 0.5, %v1029_v62  ;;  %v1038_v31 = vmul.f32 %v1036_v52, %v1030_v27 }
 0xc5c   :  { %v1033_v34 = vsel %vm242_vm3, %v1515_v15, %v1031_v49  ;;  %v1288_v15 = vld [vmem:[#allocation2] ss:$0 sm:$0xff] }
 0xc5d   :  { %v1039_v14 = vmul.f32 %v1033_v34, %v1030_v27 }
 0xc5f   :  { %1041 = vrot.lane.b32.xlu0 %v1039_v14, %s1526_s0 }
 0xcd1   :  { %v1042_v37 = vpop.permute.xlu0 %1041 }
 0xcd2   :  { %v1044_v0 = vadd.f32 %v1042_v37, %v1038_v31 }
 0xcd4   :  { %1516 = vtanh.f32 %v1044_v0  ;;  %1055 = vrot.lane.b32.xlu0 %v1044_v0, %s1526_s0 }
 0xcde   :  { %v1517_v1 = vpop.eup %1516 }
 0xcdf   :  { %v1046_v4 = vmul.f32 %v1517_v1, %v1033_v34 }
 0xce1   :  { %1050 = vrot.lane.b32.xlu1 %v1046_v4, %s1526_s0 }
 0xd46   :  { %v1056_v59 = vpop.permute.xlu0 %1055 }
 0xd47   :  { %v1058_v24 = vsel %vm1048_vm12, %v1056_v59, %v943_v46  ;;  %v1186_v46 = vld [vmem:[%s2104_s6 + $0x38] sm:$0xff] }
 0xd48   :  { %1150 = vrot.lane.b32.xlu1 %v1058_v24, %s1526_s0 }
 0xd4c   :  { %1174 = vperm.xlu1 %1475, %v1169_v2  }
 0xd53   :  { %v1051_v13 = vpop.permute.xlu1 %1050 }
 0xd54   :  { %v2036_v35 = vsel %vm1048_vm12, %v1051_v13, %v938_v20  ;;  %v1460_v20 = vpack.c.bf16 %v1186_v46, %v1185_v12 }
 0xd55   :  { %1287 = vmatmul.mubr.msk.f32.vlgmr.msra.gmra.mrb[8].mxu1 %vm252_vm6, %v2036_v35 }
 0xdba   :  { %v1151_v44 = vpop.permute.xlu1 %1150 }
 0xdcb   :  { %v1175_v5 = vpop.permute.xlu1 %1174 }
 0xdcc   :  { %v1177_v9 = vsel %vm245_vm4, %v1175_v5, 1.0 }
 0xe28   :  { %v1130_v16 = vpop.f32.mrb[8].mxu1 }
 0xe29   :  { %v1135_v21 = vadd.f32 %v1130_v16, %v1059_v48  ;;  %v1132_v23 = vpop.f32.mrb[9].mxu1 }
 0xe2a   :  { %v1136_v28 = vadd.f32 %v1132_v23, %v1060_v45  ;;  %v1534_v45 = vmov 0.0|0.0  }
 0xe2b   :  { %v1137_v30 = vmul.f32 0.5, %v1135_v21  ;;  %1450 = vmatprep.subr.bf16.mxu0 %v1534_v45 }
 0xe2c   :  { %v1138_v33 = vmul.f32 0.5, %v1136_v28  ;;  %1452 = vmatpush3.bf16.msra.mxu0 %v1451_v57 }
 0xe2d   :  { %1518 = vtanh.f32 %v1137_v30  ;;  %1453 = vmatprep.subr.bf16.mxu0 %v1534_v45 }
 0xe2e   :  { %v1140_v6 = vsel %vm242_vm3, %v1136_v28, %v1138_v33 }
 0xe2f   :  { %1520 = vtanh.f32 %v1140_v6 }
 0xe30   :  { %1455 = vmatpush3.bf16.msra.mxu0 %v1454_v19 }
 0xe31   :  { %1456 = vmatprep.subr.bf16.mxu0 %v1534_v45 }
 0xe34   :  { %1458 = vmatpush3.bf16.msra.mxu0 %v1457_v40 }
 0xe35   :  { %1459 = vmatprep.subr.bf16.mxu0 %v1534_v45 }
 0xe37   :  { %v1519_v38 = vpop.eup %1518 }
 0xe38   :  { %v1143_v48 = vmul.f32 0.5, %v1519_v38  ;;  %1461 = vmatpush3.bf16.msra.mxu0 %v1460_v20 }
 0xe39   :  { %v1521_v39 = vpop.eup %1520 }
 0xe3a   :  { %v1144_v7 = vmul.f32 0.5, %v1521_v39  ;;  %v1145_v54 = vadd.f32 0.5, %v1143_v48 }
 0xe3c   :  { %v1146_v18 = vadd.f32 0.5, %v1144_v7  ;;  %v1153_v43 = vmul.f32 %v1151_v44, %v1145_v54 }
 0xe3e   :  { %v1148_v41 = vsel %vm242_vm3, %v1521_v39, %v1146_v18 }
 0xe3f   :  { %v1154_v42 = vmul.f32 %v1148_v41, %v1145_v54 }
 0xe41   :  { %1156 = vrot.lane.b32.xlu0 %v1154_v42, %s1526_s0 }
 0xeb3   :  { %v1157_v36 = vpop.permute.xlu0 %1156 }
 0xeb4   :  { %v1159_v47 = vadd.f32 %v1157_v36, %v1153_v43 }
 0xeb6   :  { %1522 = vtanh.f32 %v1159_v47 }
 0xec0   :  { %v1523_v61 = vpop.eup %1522 }
 0xec1   :  { %v1161_v60 = vmul.f32 %v1523_v61, %v1148_v41 }
 0xec3   :  { %1165 = vrot.lane.b32.xlu0 %v1161_v60, %s1526_s0 }
 0xf35   :  { %v1166_v3 = vpop.permute.xlu0 %1165 }
 0xf36   :  { %v1168_v63 = vsel %vm1163_vm14, %v1166_v3, %v2036_v35 }
 0xf37   :  { %v1178_v8 = vmul.f32 %v1177_v9, %v1168_v63 }
 0xf39   :  { %1316 = vmatmul.mubr.msk.f32.vlgmr.msra.gmra.mrb[22].mxu0 %vm252_vm6, %v1178_v8 }
0x100c   :  { %v1263_v25 = vpop.f32.mrb[22].mxu0 }
0x100d   :  { %v1264_v62 = vadd.f32 %v1288_v15, %v1263_v25  ;;  %v1317_v49 = vpop.f32.mrb[23].mxu0 }
0x100f   :  { %1268 = vst.msk [vmem:[%s2106_s8] sm:$0xff] %vm1267_vm15, %v1264_v62 }

</bundles_post_ra>
